<compile_context>
chip_gen: v6e
topology: v6e:2x2x1
jax: 0.10.0
libtpu: 0.0.40
codegen_flags: <defaults>
</compile_context>

<pallas_src>
import functools
import math

import jax
import jax.numpy as jnp
from jax.experimental import pallas as pl
from jax.experimental.pallas import tpu as pltpu


def _rup(x, m):
    return ((x + m - 1) // m) * m


def _lcm(a, b):
    return a * b // math.gcd(a, b)


# ----------------------------------------------------------------------------
# Kernel: one grid step = `tile_lb` (layer,batch) elements, both streams.
# ----------------------------------------------------------------------------
def _graph_header_kernel(
    x_ref,        # (TLB, N, D)        f32 graph features (obj rows then rel rows)
    obj_w_ref,    # (D, CATO)          bf16 fused [obj_cls | obj2obj | obj2rel | bbox-l0]
    obj_b_ref,    # (1, CATO)          f32 fused bias
    bb_w2_ref,    # (DP, DP)           bf16 bbox MLP layer-1 (zero padded)
    bb_b2_ref,    # (1, DP)            f32
    bb_w3_ref,    # (DP, PBOX)         bf16 bbox MLP layer-2 (zero padded)
    bb_b3_ref,    # (1, PBOX)          f32
    rel_w_ref,    # (D, CATR)          bf16 fused [rel_cls | rel2obj | rel2rel]
    rel_b_ref,    # (1, CATR)          f32 fused bias
    obj_out_ref,  # (TLB*nobj, WOBJ)   out: [cls | sig(o2o) | sig(o2r) | sig(box)]
    rel_out_ref,  # (TLB*nrel, WREL)   out: [cls | sig(r2o) | sig(r2r)]
    *, tile_lb, nobj, nrel, p_ocls, p_o2o, p_o2r, dp, p_box,
       p_rcls, p_r2o, p_r2r,
):
    f32 = jnp.float32
    bb0 = p_ocls + p_o2o + p_o2r          # bbox layer-0 segment offset (weights)
    box_off = p_ocls + p_o2o + p_o2r      # box segment offset (output slab)
    o2r_off = p_ocls + p_o2o
    r2r_off = p_rcls + p_r2o
    odt = obj_out_ref.dtype
    rdt = rel_out_ref.dtype

    # Short static unroll over the (layer,batch) elements of this tile.
    for l in range(tile_lb):
        x_l = x_ref[l]                                     # (N, D) f32
        xo = x_l[:nobj, :].astype(jnp.bfloat16)            # (nobj, D)
        xr = x_l[nobj:, :].astype(jnp.bfloat16)            # (nrel, D)
        ro0, ro1 = l * nobj, (l + 1) * nobj
        rr0, rr1 = l * nrel, (l + 1) * nrel

        # ---------------- object stream (segment-at-a-time) -----------------
        y = jnp.dot(xo, obj_w_ref[:, 0:p_ocls],
                    preferred_element_type=f32) + obj_b_ref[:, 0:p_ocls]
        obj_out_ref[ro0:ro1, 0:p_ocls] = y.astype(odt)

        y = jnp.dot(xo, obj_w_ref[:, p_ocls:p_ocls + p_o2o],
                    preferred_element_type=f32) + obj_b_ref[:, p_ocls:p_ocls + p_o2o]
        obj_out_ref[ro0:ro1, p_ocls:p_ocls + p_o2o] = jax.nn.sigmoid(y).astype(odt)

        y = jnp.dot(xo, obj_w_ref[:, o2r_off:o2r_off + p_o2r],
                    preferred_element_type=f32) + obj_b_ref[:, o2r_off:o2r_off + p_o2r]
        obj_out_ref[ro0:ro1, o2r_off:o2r_off + p_o2r] = jax.nn.sigmoid(y).astype(odt)

        # bbox MLP: relu(l0) -> relu(l1) -> sigmoid(l2)
        h = jnp.dot(xo, obj_w_ref[:, bb0:bb0 + dp],
                    preferred_element_type=f32) + obj_b_ref[:, bb0:bb0 + dp]
        h = jnp.maximum(h, 0.0).astype(jnp.bfloat16)
        h = jnp.dot(h, bb_w2_ref[...], preferred_element_type=f32) + bb_b2_ref[...]
        h = jnp.maximum(h, 0.0).astype(jnp.bfloat16)
        box = jnp.dot(h, bb_w3_ref[...], preferred_element_type=f32) + bb_b3_ref[...]
        obj_out_ref[ro0:ro1, box_off:box_off + p_box] = jax.nn.sigmoid(box).astype(odt)

        # ---------------- relation stream ------------------------------------
        y = jnp.dot(xr, rel_w_ref[:, 0:p_rcls],
                    preferred_element_type=f32) + rel_b_ref[:, 0:p_rcls]
        rel_out_ref[rr0:rr1, 0:p_rcls] = y.astype(rdt)

        y = jnp.dot(xr, rel_w_ref[:, p_rcls:p_rcls + p_r2o],
                    preferred_element_type=f32) + rel_b_ref[:, p_rcls:p_rcls + p_r2o]
        rel_out_ref[rr0:rr1, p_rcls:p_rcls + p_r2o] = jax.nn.sigmoid(y).astype(rdt)

        y = jnp.dot(xr, rel_w_ref[:, r2r_off:r2r_off + p_r2r],
                    preferred_element_type=f32) + rel_b_ref[:, r2r_off:r2r_off + p_r2r]
        rel_out_ref[rr0:rr1, r2r_off:r2r_off + p_r2r] = jax.nn.sigmoid(y).astype(rdt)


# ----------------------------------------------------------------------------
# Parameter handling
# ----------------------------------------------------------------------------
def init_graph_header_params(key, d_model, num_obj_classes, num_rel_classes):
    """Deterministic synthetic params; weights are [in_dim, out_dim]."""
    c_obj, c_rel = num_obj_classes + 1, num_rel_classes + 1
    specs = [
        ("obj_class", d_model, c_obj),
        ("rel_class", d_model, c_rel),
        ("obj2obj", d_model, c_obj * 8),
        ("obj2rel", d_model, c_rel * 2),
        ("rel2obj", d_model, c_obj * 2),
        ("rel2rel", d_model, c_rel * 4),
        ("bbox1", d_model, d_model),
        ("bbox2", d_model, d_model),
        ("bbox3", d_model, 4),
    ]
    keys = jax.random.split(key, 2 * len(specs))
    params = {}
    for idx, (name, n_in, n_out) in enumerate(specs):
        bound = 1.0 / (n_in ** 0.5)
        params[f"{name}_w"] = jax.random.uniform(
            keys[2 * idx], (n_in, n_out), jnp.float32, -bound, bound)
        params[f"{name}_b"] = jax.random.uniform(
            keys[2 * idx + 1], (n_out,), jnp.float32, -bound, bound)
    return params


def prepare_graph_header_params(raw, *, lane_multiple=128):
    """Fuse + 128-lane-pad + bf16-cast the weights once (host-side, one time).

    Keep lane_multiple=128 on all generations (256 buys no MXU efficiency and
    inflates padding / HBM writeback for the small heads).
    """
    d = raw["obj_class_w"].shape[0]
    c_obj = raw["obj_class_w"].shape[1]
    c_rel = raw["rel_class_w"].shape[1]
    dp = _rup(d, lane_multiple)
    box_pad = lane_multiple

    def fuse(names):
        ws = [raw[f"{n}_w"] for n in names]
        bs = [raw[f"{n}_b"] for n in names]
        pads = tuple(_rup(w.shape[1], lane_multiple) for w in ws)
        total = sum(pads)
        wcat = jnp.zeros((d, total), jnp.float32)
        bcat = jnp.zeros((1, total), jnp.float32)
        off = 0
        for w, b_, p in zip(ws, bs, pads):
            wcat = wcat.at[:, off:off + w.shape[1]].set(w)
            bcat = bcat.at[0, off:off + b_.shape[0]].set(b_)
            off += p
        return wcat.astype(jnp.bfloat16), bcat, pads

    obj_wcat, obj_bcat, obj_pad = fuse(["obj_class", "obj2obj", "obj2rel", "bbox1"])
    rel_wcat, rel_bcat, rel_pad = fuse(["rel_class", "rel2obj", "rel2rel"])

    w2p = (jnp.zeros((dp, dp), jnp.float32)
           .at[:d, :d].set(raw["bbox2_w"]).astype(jnp.bfloat16))
    b2p = jnp.zeros((1, dp), jnp.float32).at[0, :d].set(raw["bbox2_b"])
    w3p = (jnp.zeros((dp, box_pad), jnp.float32)
           .at[:d, :4].set(raw["bbox3_w"]).astype(jnp.bfloat16))
    b3p = jnp.zeros((1, box_pad), jnp.float32).at[0, :4].set(raw["bbox3_b"])

    return dict(
        d_model=d, c_obj=c_obj, c_rel=c_rel,
        obj_wcat=obj_wcat, obj_bcat=obj_bcat, obj_pad=obj_pad,
        rel_wcat=rel_wcat, rel_bcat=rel_bcat, rel_pad=rel_pad,
        bbox_w2=w2p, bbox_b2=b2p, bbox_w3=w3p, bbox_b3=b3p,
        box_pad=box_pad,
    )


# ----------------------------------------------------------------------------
# Forward
# ----------------------------------------------------------------------------
def graph_header_forward(graph_features, prepared, *, num_obj_query,
                         target_rows_per_tile=1024, max_tile_lb=8,
                         vmem_budget_bytes=12 * 1024 * 1024,
                         store_dtype=jnp.float32):
    """Pallas forward of GraphHeaderWithExknowledge.

    graph_features: [num_layer, b, num_nodes, d_model]
    Returns the same 7-tuple as the PyTorch module (float32).
    """
    num_layer, b, num_nodes, d = graph_features.shape
    assert d == prepared["d_model"]
    nobj = num_obj_query
    nrel = num_nodes - num_obj_query
    # TODO(synk): degenerate empty obj/rel streams are not supported.
    assert nobj > 0 and nrel > 0
    lb = num_layer * b

    if graph_features.dtype not in (jnp.float32, jnp.bfloat16):
        graph_features = graph_features.astype(jnp.float32)
    # Free view: collapse (layer, batch) -> one leading axis; no slice/cast copy.
    x3 = graph_features.reshape(lb, num_nodes, d)

    p_ocls, p_o2o, p_o2r, dp = prepared["obj_pad"]
    p_rcls, p_r2o, p_r2r = prepared["rel_pad"]
    p_box = prepared["box_pad"]
    w_obj = p_ocls + p_o2o + p_o2r + p_box
    w_rel = p_rcls + p_r2o + p_r2r

    store_dtype = jnp.dtype(store_dtype)
    out_bytes = store_dtype.itemsize
    sub = 8 if out_bytes == 4 else 16          # sublane tile (f32 vs bf16 outputs)

    # ---- explicit VMEM budget -> tile size (v7x has only 64 MiB/TC) ----
    x_bytes = jnp.dtype(x3.dtype).itemsize
    weight_bytes = 2 * sum(int(prepared[k].size) * prepared[k].dtype.itemsize
                           for k in ("obj_wcat", "obj_bcat", "bbox_w2", "bbox_b2",
                                     "bbox_w3", "bbox_b3", "rel_wcat", "rel_bcat"))
    per_lb_bytes = 2 * (num_nodes * d * x_bytes          # double-buffered x tile
                        + nobj * w_obj * out_bytes       # double-buffered obj slab
                        + nrel * w_rel * out_bytes)      # double-buffered rel slab
    unit = _lcm(sub // math.gcd(nobj, sub), sub // math.gcd(nrel, sub))
    cap_rows = max(1, target_rows_per_tile // num_nodes)
    cap_vmem = max(1, (vmem_budget_bytes - weight_bytes) // max(per_lb_bytes, 1))
    cap_mega = max(1, -(-lb // 2))             # keep grid >= 2 so both v7x TCs work
    tile_lb = min(cap_rows, int(cap_vmem), cap_mega, max_tile_lb, lb)
    tile_lb = (tile_lb // unit) * unit
    if tile_lb <= 0:
        tile_lb = lb                           # full-extent block: always layout-legal
    grid = (pl.cdiv(lb, tile_lb),)             # ragged last block, no activation pad

    kernel = functools.partial(
        _graph_header_kernel,
        tile_lb=tile_lb, nobj=nobj, nrel=nrel,
        p_ocls=p_ocls, p_o2o=p_o2o, p_o2r=p_o2r, dp=dp, p_box=p_box,
        p_rcls=p_rcls, p_r2o=p_r2o, p_r2r=p_r2r)

    def const_spec(shape):
        # Constant index_map -> weight DMA'd once, stays resident in VMEM.
        return pl.BlockSpec(shape, lambda i: (0,) * len(shape))

    in_specs = [
        pl.BlockSpec((tile_lb, num_nodes, d), lambda i: (i, 0, 0)),
        const_spec(prepared["obj_wcat"].shape), const_spec(prepared["obj_bcat"].shape),
        const_spec(prepared["bbox_w2"].shape), const_spec(prepared["bbox_b2"].shape),
        const_spec(prepared["bbox_w3"].shape), const_spec(prepared["bbox_b3"].shape),
        const_spec(prepared["rel_wcat"].shape), const_spec(prepared["rel_bcat"].shape),
    ]
    out_shape = (
        jax.ShapeDtypeStruct((lb * nobj, w_obj), store_dtype),
        jax.ShapeDtypeStruct((lb * nrel, w_rel), store_dtype),
    )
    out_specs = [
        pl.BlockSpec((tile_lb * nobj, w_obj), lambda i: (i, 0)),
        pl.BlockSpec((tile_lb * nrel, w_rel), lambda i: (i, 0)),
    ]

    obj_slab, rel_slab = pl.pallas_call(
        kernel,
        out_shape=out_shape,
        grid_spec=pltpu.PrefetchScalarGridSpec(
            num_scalar_prefetch=0, grid=grid,
            in_specs=in_specs, out_specs=out_specs),
        compiler_params=pltpu.CompilerParams(
            dimension_semantics=("parallel",),
            vmem_limit_bytes=max(32 * 1024 * 1024, int(1.5 * vmem_budget_bytes))),
    )(x3, prepared["obj_wcat"], prepared["obj_bcat"],
      prepared["bbox_w2"], prepared["bbox_b2"],
      prepared["bbox_w3"], prepared["bbox_b3"],
      prepared["rel_wcat"], prepared["rel_bcat"])

    c_obj, c_rel = prepared["c_obj"], prepared["c_rel"]
    obj_slab = obj_slab.astype(jnp.float32).reshape(num_layer, b, nobj, w_obj)
    rel_slab = rel_slab.astype(jnp.float32).reshape(num_layer, b, nrel, w_rel)

    obj_class_logits = obj_slab[..., 0:c_obj]
    obj2obj = obj_slab[..., p_ocls:p_ocls + c_obj * 8]
    o2r_off = p_ocls + p_o2o
    obj2rel = obj_slab[..., o2r_off:o2r_off + c_rel * 2]
    box_off = p_ocls + p_o2o + p_o2r
    obj_box_coords = obj_slab[..., box_off:box_off + 4]

    rel_class_logits = rel_slab[..., 0:c_rel]
    rel2obj = rel_slab[..., p_rcls:p_rcls + c_obj * 2]
    r2r_off = p_rcls + p_r2o
    rel2rel = rel_slab[..., r2r_off:r2r_off + c_rel * 4]

    return (obj_class_logits, obj_box_coords, rel_class_logits,
            obj2obj, obj2rel, rel2obj, rel2rel)


# ----------------------------------------------------------------------------
# Pure-JAX reference (same bf16 matmul inputs, f32 accumulation/activations)
# ----------------------------------------------------------------------------
def _reference_forward(graph_features, raw, *, num_obj_query):
    bf16, f32 = jnp.bfloat16, jnp.float32

    def lin(x, w, b):
        return jnp.dot(x.astype(bf16), w.astype(bf16),
                       preferred_element_type=f32) + b

    xo = graph_features[:, :, :num_obj_query, :]
    xr = graph_features[:, :, num_obj_query:, :]

    obj_logits = lin(xo, raw["obj_class_w"], raw["obj_class_b"])
    rel_logits = lin(xr, raw["rel_class_w"], raw["rel_class_b"])
    o2o = jax.nn.sigmoid(lin(xo, raw["obj2obj_w"], raw["obj2obj_b"]))
    o2r = jax.nn.sigmoid(lin(xo, raw["obj2rel_w"], raw["obj2rel_b"]))
    r2o = jax.nn.sigmoid(lin(xr, raw["rel2obj_w"], raw["rel2obj_b"]))
    r2r = jax.nn.sigmoid(lin(xr, raw["rel2rel_w"], raw["rel2rel_b"]))

    h = jnp.maximum(lin(xo, raw["bbox1_w"], raw["bbox1_b"]), 0.0)
    h = jnp.maximum(lin(h, raw["bbox2_w"], raw["bbox2_b"]), 0.0)
    box = jax.nn.sigmoid(lin(h, raw["bbox3_w"], raw["bbox3_b"]))

    return obj_logits, box, rel_logits, o2o, o2r, r2o, r2r


if __name__ == "__main__":
    key = jax.random.PRNGKey(0)
    k_x, k_p = jax.random.split(key)

    # Small shapes: num_layer=2, batch=2, num_nodes=12 (8 obj + 4 rel queries),
    # d_model=32, 7 object classes, 5 relation classes.
    num_layer, batch, num_nodes, d_model = 2, 2, 12, 32
    num_obj_classes, num_rel_classes, num_obj_query = 7, 5, 8

    x = jax.random.normal(k_x, (num_layer, batch, num_nodes, d_model), jnp.float32)
    raw_params = init_graph_header_params(k_p, d_model, num_obj_classes, num_rel_classes)
    prepared = prepare_graph_header_params(raw_params)

    outs = graph_header_forward(x, prepared, num_obj_query=num_obj_query)
    outs = jax.block_until_ready(outs)

    (obj_cls, obj_box, rel_cls, o2o, o2r, r2o, r2r) = outs
    c_obj, c_rel = num_obj_classes + 1, num_rel_classes + 1
    n_rel_q = num_nodes - num_obj_query

    assert obj_cls.shape == (num_layer, batch, num_obj_query, c_obj)
    assert obj_box.shape == (num_layer, batch, num_obj_query, 4)
    assert rel_cls.shape == (num_layer, batch, n_rel_q, c_rel)
    assert o2o.shape == (num_layer, batch, num_obj_query, c_obj * 8)
    assert o2r.shape == (num_layer, batch, num_obj_query, c_rel * 2)
    assert r2o.shape == (num_layer, batch, n_rel_q, c_obj * 2)
    assert r2r.shape == (num_layer, batch, n_rel_q, c_rel * 4)

    refs = _reference_forward(x, raw_params, num_obj_query=num_obj_query)
    # bf16 matmul inputs on both sides, f32 accumulation -> tight tolerance.
    for got, want in zip(outs, refs):
        assert jnp.allclose(got, want, atol=2e-3, rtol=2e-3), "mismatch vs reference"

    print("KERNEL_OK")
</pallas_src>

<mosaic_0001>
module attributes {stable_mosaic.version = 11 : i64} {
  func.func @_graph_header_kernel(%arg0: i32, %arg1: memref<2x12x32xf32, #tpu.memory_space<vmem>>, %arg2: memref<32x512xbf16, #tpu.memory_space<vmem>>, %arg3: memref<1x512xf32, #tpu.memory_space<vmem>>, %arg4: memref<128x128xbf16, #tpu.memory_space<vmem>>, %arg5: memref<1x128xf32, #tpu.memory_space<vmem>>, %arg6: memref<128x128xbf16, #tpu.memory_space<vmem>>, %arg7: memref<1x128xf32, #tpu.memory_space<vmem>>, %arg8: memref<32x384xbf16, #tpu.memory_space<vmem>>, %arg9: memref<1x384xf32, #tpu.memory_space<vmem>>, %arg10: memref<16x512xf32, #tpu.memory_space<vmem>>, %arg11: memref<8x384xf32, #tpu.memory_space<vmem>>) attributes {dimension_semantics = [#tpu.dimension_semantics<parallel>], iteration_bounds = array<i64: 2>, scalar_prefetch = 0 : i64, scratch_operands = 0 : i64, tpu.core_type = #tpu.core_type<tc>, window_params = [{transform_indices = @transform_0, window_bounds = array<i64: 2, 12, 32>}, {pipeline_mode = #tpu.pipeline_mode<synchronous>, transform_indices = @transform_1, window_bounds = array<i64: 32, 512>}, {pipeline_mode = #tpu.pipeline_mode<synchronous>, transform_indices = @transform_2, window_bounds = array<i64: 1, 512>}, {pipeline_mode = #tpu.pipeline_mode<synchronous>, transform_indices = @transform_3, window_bounds = array<i64: 128, 128>}, {pipeline_mode = #tpu.pipeline_mode<synchronous>, transform_indices = @transform_4, window_bounds = array<i64: 1, 128>}, {pipeline_mode = #tpu.pipeline_mode<synchronous>, transform_indices = @transform_5, window_bounds = array<i64: 128, 128>}, {pipeline_mode = #tpu.pipeline_mode<synchronous>, transform_indices = @transform_6, window_bounds = array<i64: 1, 128>}, {pipeline_mode = #tpu.pipeline_mode<synchronous>, transform_indices = @transform_7, window_bounds = array<i64: 32, 384>}, {pipeline_mode = #tpu.pipeline_mode<synchronous>, transform_indices = @transform_8, window_bounds = array<i64: 1, 384>}, {transform_indices = @transform_9, window_bounds = array<i64: 16, 512>}, {transform_indices = @transform_10, window_bounds = array<i64: 8, 384>}]} {
    %c0 = arith.constant 0 : index
    %c0_0 = arith.constant 0 : index
    %c0_1 = arith.constant 0 : index
    %0 = vector.load %arg1[%c0, %c0_0, %c0_1] : memref<2x12x32xf32, #tpu.memory_space<vmem>>, vector<1x12x32xf32>
    %1 = vector.shape_cast %0 : vector<1x12x32xf32> to vector<12x32xf32>
    %2 = vector.extract_strided_slice %1 {offsets = [0, 0], sizes = [8, 32], strides = [1, 1]} : vector<12x32xf32> to vector<8x32xf32>
    %3 = arith.truncf %2 : vector<8x32xf32> to vector<8x32xbf16>
    %4 = vector.extract_strided_slice %1 {offsets = [8, 0], sizes = [4, 32], strides = [1, 1]} : vector<12x32xf32> to vector<4x32xf32>
    %5 = arith.truncf %4 : vector<4x32xf32> to vector<4x32xbf16>
    %c0_2 = arith.constant 0 : index
    %c0_3 = arith.constant 0 : index
    %6 = vector.load %arg2[%c0_2, %c0_3] : memref<32x512xbf16, #tpu.memory_space<vmem>>, vector<32x128xbf16>
    %cst = arith.constant dense<0.000000e+00> : vector<8x128xf32>
    %7 = tpu.matmul %3, %6, %cst {dimension_numbers = #tpu.dot_dimension_numbers<[1], [0], [0], [1], [0, 0, 1, 1], [], []>} : vector<8x32xbf16>, vector<32x128xbf16>, vector<8x128xf32> -> vector<8x128xf32>
    %c0_4 = arith.constant 0 : index
    %c0_5 = arith.constant 0 : index
    %8 = vector.load %arg3[%c0_4, %c0_5] : memref<1x512xf32, #tpu.memory_space<vmem>>, vector<1x128xf32>
    %9 = vector.broadcast %8 : vector<1x128xf32> to vector<8x128xf32>
    %10 = arith.addf %7, %9 : vector<8x128xf32>
    %c0_6 = arith.constant 0 : index
    %c0_7 = arith.constant 0 : index
    %11 = vector.load %arg10[%c0_6, %c0_7] : memref<16x512xf32, #tpu.memory_space<vmem>>, vector<8x128xf32>
    tpu.vector_store %arg10[%c0_6, %c0_7], %10 {strides = array<i32>} : memref<16x512xf32, #tpu.memory_space<vmem>>, vector<8x128xf32>,
    %c0_8 = arith.constant 0 : index
    %c128 = arith.constant 128 : index
    %12 = vector.load %arg2[%c0_8, %c128] : memref<32x512xbf16, #tpu.memory_space<vmem>>, vector<32x128xbf16>
    %cst_9 = arith.constant dense<0.000000e+00> : vector<8x128xf32>
    %13 = tpu.matmul %3, %12, %cst_9 {dimension_numbers = #tpu.dot_dimension_numbers<[1], [0], [0], [1], [0, 0, 1, 1], [], []>} : vector<8x32xbf16>, vector<32x128xbf16>, vector<8x128xf32> -> vector<8x128xf32>
    %c0_10 = arith.constant 0 : index
    %c128_11 = arith.constant 128 : index
    %14 = vector.load %arg3[%c0_10, %c128_11] : memref<1x512xf32, #tpu.memory_space<vmem>>, vector<1x128xf32>
    %15 = vector.broadcast %14 : vector<1x128xf32> to vector<8x128xf32>
    %16 = arith.addf %13, %15 : vector<8x128xf32>
    %17 = arith.negf %16 : vector<8x128xf32>
    %18 = math.exp %17 : vector<8x128xf32>
    %cst_12 = arith.constant 1.000000e+00 : f32
    %19 = vector.broadcast %cst_12 : f32 to vector<8x128xf32>
    %20 = arith.addf %19, %18 : vector<8x128xf32>
    %21 = arith.divf %19, %20 : vector<8x128xf32>
    %c0_13 = arith.constant 0 : index
    %c128_14 = arith.constant 128 : index
    %22 = vector.load %arg10[%c0_13, %c128_14] : memref<16x512xf32, #tpu.memory_space<vmem>>, vector<8x128xf32>
    tpu.vector_store %arg10[%c0_13, %c128_14], %21 {strides = array<i32>} : memref<16x512xf32, #tpu.memory_space<vmem>>, vector<8x128xf32>,
    %c0_15 = arith.constant 0 : index
    %c256 = arith.constant 256 : index
    %23 = vector.load %arg2[%c0_15, %c256] : memref<32x512xbf16, #tpu.memory_space<vmem>>, vector<32x128xbf16>
    %cst_16 = arith.constant dense<0.000000e+00> : vector<8x128xf32>
    %24 = tpu.matmul %3, %23, %cst_16 {dimension_numbers = #tpu.dot_dimension_numbers<[1], [0], [0], [1], [0, 0, 1, 1], [], []>} : vector<8x32xbf16>, vector<32x128xbf16>, vector<8x128xf32> -> vector<8x128xf32>
    %c0_17 = arith.constant 0 : index
    %c256_18 = arith.constant 256 : index
    %25 = vector.load %arg3[%c0_17, %c256_18] : memref<1x512xf32, #tpu.memory_space<vmem>>, vector<1x128xf32>
    %26 = vector.broadcast %25 : vector<1x128xf32> to vector<8x128xf32>
    %27 = arith.addf %24, %26 : vector<8x128xf32>
    %28 = arith.negf %27 : vector<8x128xf32>
    %29 = math.exp %28 : vector<8x128xf32>
    %cst_19 = arith.constant 1.000000e+00 : f32
    %30 = vector.broadcast %cst_19 : f32 to vector<8x128xf32>
    %31 = arith.addf %30, %29 : vector<8x128xf32>
    %32 = arith.divf %30, %31 : vector<8x128xf32>
    %c0_20 = arith.constant 0 : index
    %c256_21 = arith.constant 256 : index
    %33 = vector.load %arg10[%c0_20, %c256_21] : memref<16x512xf32, #tpu.memory_space<vmem>>, vector<8x128xf32>
    tpu.vector_store %arg10[%c0_20, %c256_21], %32 {strides = array<i32>} : memref<16x512xf32, #tpu.memory_space<vmem>>, vector<8x128xf32>,
    %c0_22 = arith.constant 0 : index
    %c384 = arith.constant 384 : index
    %34 = vector.load %arg2[%c0_22, %c384] : memref<32x512xbf16, #tpu.memory_space<vmem>>, vector<32x128xbf16>
    %cst_23 = arith.constant dense<0.000000e+00> : vector<8x128xf32>
    %35 = tpu.matmul %3, %34, %cst_23 {dimension_numbers = #tpu.dot_dimension_numbers<[1], [0], [0], [1], [0, 0, 1, 1], [], []>} : vector<8x32xbf16>, vector<32x128xbf16>, vector<8x128xf32> -> vector<8x128xf32>
    %c0_24 = arith.constant 0 : index
    %c384_25 = arith.constant 384 : index
    %36 = vector.load %arg3[%c0_24, %c384_25] : memref<1x512xf32, #tpu.memory_space<vmem>>, vector<1x128xf32>
    %37 = vector.broadcast %36 : vector<1x128xf32> to vector<8x128xf32>
    %38 = arith.addf %35, %37 : vector<8x128xf32>
    %cst_26 = arith.constant 0.000000e+00 : f32
    %39 = vector.broadcast %cst_26 : f32 to vector<8x128xf32>
    %40 = arith.maximumf %38, %39 : vector<8x128xf32>
    %41 = arith.truncf %40 : vector<8x128xf32> to vector<8x128xbf16>
    %c0_27 = arith.constant 0 : index
    %c0_28 = arith.constant 0 : index
    %42 = vector.load %arg4[%c0_27, %c0_28] : memref<128x128xbf16, #tpu.memory_space<vmem>>, vector<128x128xbf16>
    %cst_29 = arith.constant dense<0.000000e+00> : vector<8x128xf32>
    %43 = tpu.matmul %41, %42, %cst_29 {dimension_numbers = #tpu.dot_dimension_numbers<[1], [0], [0], [1], [0, 0, 1, 1], [], []>} : vector<8x128xbf16>, vector<128x128xbf16>, vector<8x128xf32> -> vector<8x128xf32>
    %c0_30 = arith.constant 0 : index
    %c0_31 = arith.constant 0 : index
    %44 = vector.load %arg5[%c0_30, %c0_31] : memref<1x128xf32, #tpu.memory_space<vmem>>, vector<1x128xf32>
    %45 = vector.broadcast %44 : vector<1x128xf32> to vector<8x128xf32>
    %46 = arith.addf %43, %45 : vector<8x128xf32>
    %cst_32 = arith.constant 0.000000e+00 : f32
    %47 = vector.broadcast %cst_32 : f32 to vector<8x128xf32>
    %48 = arith.maximumf %46, %47 : vector<8x128xf32>
    %49 = arith.truncf %48 : vector<8x128xf32> to vector<8x128xbf16>
    %c0_33 = arith.constant 0 : index
    %c0_34 = arith.constant 0 : index
    %50 = vector.load %arg6[%c0_33, %c0_34] : memref<128x128xbf16, #tpu.memory_space<vmem>>, vector<128x128xbf16>
    %cst_35 = arith.constant dense<0.000000e+00> : vector<8x128xf32>
    %51 = tpu.matmul %49, %50, %cst_35 {dimension_numbers = #tpu.dot_dimension_numbers<[1], [0], [0], [1], [0, 0, 1, 1], [], []>} : vector<8x128xbf16>, vector<128x128xbf16>, vector<8x128xf32> -> vector<8x128xf32>
    %c0_36 = arith.constant 0 : index
    %c0_37 = arith.constant 0 : index
    %52 = vector.load %arg7[%c0_36, %c0_37] : memref<1x128xf32, #tpu.memory_space<vmem>>, vector<1x128xf32>
    %53 = vector.broadcast %52 : vector<1x128xf32> to vector<8x128xf32>
    %54 = arith.addf %51, %53 : vector<8x128xf32>
    %55 = arith.negf %54 : vector<8x128xf32>
    %56 = math.exp %55 : vector<8x128xf32>
    %cst_38 = arith.constant 1.000000e+00 : f32
    %57 = vector.broadcast %cst_38 : f32 to vector<8x128xf32>
    %58 = arith.addf %57, %56 : vector<8x128xf32>
    %59 = arith.divf %57, %58 : vector<8x128xf32>
    %c0_39 = arith.constant 0 : index
    %c384_40 = arith.constant 384 : index
    %60 = vector.load %arg10[%c0_39, %c384_40] : memref<16x512xf32, #tpu.memory_space<vmem>>, vector<8x128xf32>
    tpu.vector_store %arg10[%c0_39, %c384_40], %59 {strides = array<i32>} : memref<16x512xf32, #tpu.memory_space<vmem>>, vector<8x128xf32>,
    %c0_41 = arith.constant 0 : index
    %c0_42 = arith.constant 0 : index
    %61 = vector.load %arg8[%c0_41, %c0_42] : memref<32x384xbf16, #tpu.memory_space<vmem>>, vector<32x128xbf16>
    %cst_43 = arith.constant dense<0.000000e+00> : vector<4x128xf32>
    %62 = tpu.matmul %5, %61, %cst_43 {dimension_numbers = #tpu.dot_dimension_numbers<[1], [0], [0], [1], [0, 0, 1, 1], [], []>} : vector<4x32xbf16>, vector<32x128xbf16>, vector<4x128xf32> -> vector<4x128xf32>
    %c0_44 = arith.constant 0 : index
    %c0_45 = arith.constant 0 : index
    %63 = vector.load %arg9[%c0_44, %c0_45] : memref<1x384xf32, #tpu.memory_space<vmem>>, vector<1x128xf32>
    %64 = vector.broadcast %63 : vector<1x128xf32> to vector<4x128xf32>
    %65 = arith.addf %62, %64 : vector<4x128xf32>
    %c0_46 = arith.constant 0 : index
    %c0_47 = arith.constant 0 : index
    %66 = vector.load %arg11[%c0_46, %c0_47] : memref<8x384xf32, #tpu.memory_space<vmem>>, vector<4x128xf32>
    tpu.vector_store %arg11[%c0_46, %c0_47], %65 {strides = array<i32>} : memref<8x384xf32, #tpu.memory_space<vmem>>, vector<4x128xf32>,
    %c0_48 = arith.constant 0 : index
    %c128_49 = arith.constant 128 : index
    %67 = vector.load %arg8[%c0_48, %c128_49] : memref<32x384xbf16, #tpu.memory_space<vmem>>, vector<32x128xbf16>
    %cst_50 = arith.constant dense<0.000000e+00> : vector<4x128xf32>
    %68 = tpu.matmul %5, %67, %cst_50 {dimension_numbers = #tpu.dot_dimension_numbers<[1], [0], [0], [1], [0, 0, 1, 1], [], []>} : vector<4x32xbf16>, vector<32x128xbf16>, vector<4x128xf32> -> vector<4x128xf32>
    %c0_51 = arith.constant 0 : index
    %c128_52 = arith.constant 128 : index
    %69 = vector.load %arg9[%c0_51, %c128_52] : memref<1x384xf32, #tpu.memory_space<vmem>>, vector<1x128xf32>
    %70 = vector.broadcast %69 : vector<1x128xf32> to vector<4x128xf32>
    %71 = arith.addf %68, %70 : vector<4x128xf32>
    %72 = arith.negf %71 : vector<4x128xf32>
    %73 = math.exp %72 : vector<4x128xf32>
    %cst_53 = arith.constant 1.000000e+00 : f32
    %74 = vector.broadcast %cst_53 : f32 to vector<4x128xf32>
    %75 = arith.addf %74, %73 : vector<4x128xf32>
    %76 = arith.divf %74, %75 : vector<4x128xf32>
    %c0_54 = arith.constant 0 : index
    %c128_55 = arith.constant 128 : index
    %77 = vector.load %arg11[%c0_54, %c128_55] : memref<8x384xf32, #tpu.memory_space<vmem>>, vector<4x128xf32>
    tpu.vector_store %arg11[%c0_54, %c128_55], %76 {strides = array<i32>} : memref<8x384xf32, #tpu.memory_space<vmem>>, vector<4x128xf32>,
    %c0_56 = arith.constant 0 : index
    %c256_57 = arith.constant 256 : index
    %78 = vector.load %arg8[%c0_56, %c256_57] : memref<32x384xbf16, #tpu.memory_space<vmem>>, vector<32x128xbf16>
    %cst_58 = arith.constant dense<0.000000e+00> : vector<4x128xf32>
    %79 = tpu.matmul %5, %78, %cst_58 {dimension_numbers = #tpu.dot_dimension_numbers<[1], [0], [0], [1], [0, 0, 1, 1], [], []>} : vector<4x32xbf16>, vector<32x128xbf16>, vector<4x128xf32> -> vector<4x128xf32>
    %c0_59 = arith.constant 0 : index
    %c256_60 = arith.constant 256 : index
    %80 = vector.load %arg9[%c0_59, %c256_60] : memref<1x384xf32, #tpu.memory_space<vmem>>, vector<1x128xf32>
    %81 = vector.broadcast %80 : vector<1x128xf32> to vector<4x128xf32>
    %82 = arith.addf %79, %81 : vector<4x128xf32>
    %83 = arith.negf %82 : vector<4x128xf32>
    %84 = math.exp %83 : vector<4x128xf32>
    %cst_61 = arith.constant 1.000000e+00 : f32
    %85 = vector.broadcast %cst_61 : f32 to vector<4x128xf32>
    %86 = arith.addf %85, %84 : vector<4x128xf32>
    %87 = arith.divf %85, %86 : vector<4x128xf32>
    %c0_62 = arith.constant 0 : index
    %c256_63 = arith.constant 256 : index
    %88 = vector.load %arg11[%c0_62, %c256_63] : memref<8x384xf32, #tpu.memory_space<vmem>>, vector<4x128xf32>
    tpu.vector_store %arg11[%c0_62, %c256_63], %87 {strides = array<i32>} : memref<8x384xf32, #tpu.memory_space<vmem>>, vector<4x128xf32>,
    %c1 = arith.constant 1 : index
    %c0_64 = arith.constant 0 : index
    %c0_65 = arith.constant 0 : index
    %89 = vector.load %arg1[%c1, %c0_64, %c0_65] : memref<2x12x32xf32, #tpu.memory_space<vmem>>, vector<1x12x32xf32>
    %90 = vector.shape_cast %89 : vector<1x12x32xf32> to vector<12x32xf32>
    %91 = vector.extract_strided_slice %90 {offsets = [0, 0], sizes = [8, 32], strides = [1, 1]} : vector<12x32xf32> to vector<8x32xf32>
    %92 = arith.truncf %91 : vector<8x32xf32> to vector<8x32xbf16>
    %93 = vector.extract_strided_slice %90 {offsets = [8, 0], sizes = [4, 32], strides = [1, 1]} : vector<12x32xf32> to vector<4x32xf32>
    %94 = arith.truncf %93 : vector<4x32xf32> to vector<4x32xbf16>
    %c0_66 = arith.constant 0 : index
    %c0_67 = arith.constant 0 : index
    %95 = vector.load %arg2[%c0_66, %c0_67] : memref<32x512xbf16, #tpu.memory_space<vmem>>, vector<32x128xbf16>
    %cst_68 = arith.constant dense<0.000000e+00> : vector<8x128xf32>
    %96 = tpu.matmul %92, %95, %cst_68 {dimension_numbers = #tpu.dot_dimension_numbers<[1], [0], [0], [1], [0, 0, 1, 1], [], []>} : vector<8x32xbf16>, vector<32x128xbf16>, vector<8x128xf32> -> vector<8x128xf32>
    %c0_69 = arith.constant 0 : index
    %c0_70 = arith.constant 0 : index
    %97 = vector.load %arg3[%c0_69, %c0_70] : memref<1x512xf32, #tpu.memory_space<vmem>>, vector<1x128xf32>
    %98 = vector.broadcast %97 : vector<1x128xf32> to vector<8x128xf32>
    %99 = arith.addf %96, %98 : vector<8x128xf32>
    %c8 = arith.constant 8 : index
    %c0_71 = arith.constant 0 : index
    %100 = vector.load %arg10[%c8, %c0_71] : memref<16x512xf32, #tpu.memory_space<vmem>>, vector<8x128xf32>
    tpu.vector_store %arg10[%c8, %c0_71], %99 {strides = array<i32>} : memref<16x512xf32, #tpu.memory_space<vmem>>, vector<8x128xf32>,
    %c0_72 = arith.constant 0 : index
    %c128_73 = arith.constant 128 : index
    %101 = vector.load %arg2[%c0_72, %c128_73] : memref<32x512xbf16, #tpu.memory_space<vmem>>, vector<32x128xbf16>
    %cst_74 = arith.constant dense<0.000000e+00> : vector<8x128xf32>
    %102 = tpu.matmul %92, %101, %cst_74 {dimension_numbers = #tpu.dot_dimension_numbers<[1], [0], [0], [1], [0, 0, 1, 1], [], []>} : vector<8x32xbf16>, vector<32x128xbf16>, vector<8x128xf32> -> vector<8x128xf32>
    %c0_75 = arith.constant 0 : index
    %c128_76 = arith.constant 128 : index
    %103 = vector.load %arg3[%c0_75, %c128_76] : memref<1x512xf32, #tpu.memory_space<vmem>>, vector<1x128xf32>
    %104 = vector.broadcast %103 : vector<1x128xf32> to vector<8x128xf32>
    %105 = arith.addf %102, %104 : vector<8x128xf32>
    %106 = arith.negf %105 : vector<8x128xf32>
    %107 = math.exp %106 : vector<8x128xf32>
    %cst_77 = arith.constant 1.000000e+00 : f32
    %108 = vector.broadcast %cst_77 : f32 to vector<8x128xf32>
    %109 = arith.addf %108, %107 : vector<8x128xf32>
    %110 = arith.divf %108, %109 : vector<8x128xf32>
    %c8_78 = arith.constant 8 : index
    %c128_79 = arith.constant 128 : index
    %111 = vector.load %arg10[%c8_78, %c128_79] : memref<16x512xf32, #tpu.memory_space<vmem>>, vector<8x128xf32>
    tpu.vector_store %arg10[%c8_78, %c128_79], %110 {strides = array<i32>} : memref<16x512xf32, #tpu.memory_space<vmem>>, vector<8x128xf32>,
    %c0_80 = arith.constant 0 : index
    %c256_81 = arith.constant 256 : index
    %112 = vector.load %arg2[%c0_80, %c256_81] : memref<32x512xbf16, #tpu.memory_space<vmem>>, vector<32x128xbf16>
    %cst_82 = arith.constant dense<0.000000e+00> : vector<8x128xf32>
    %113 = tpu.matmul %92, %112, %cst_82 {dimension_numbers = #tpu.dot_dimension_numbers<[1], [0], [0], [1], [0, 0, 1, 1], [], []>} : vector<8x32xbf16>, vector<32x128xbf16>, vector<8x128xf32> -> vector<8x128xf32>
    %c0_83 = arith.constant 0 : index
    %c256_84 = arith.constant 256 : index
    %114 = vector.load %arg3[%c0_83, %c256_84] : memref<1x512xf32, #tpu.memory_space<vmem>>, vector<1x128xf32>
    %115 = vector.broadcast %114 : vector<1x128xf32> to vector<8x128xf32>
    %116 = arith.addf %113, %115 : vector<8x128xf32>
    %117 = arith.negf %116 : vector<8x128xf32>
    %118 = math.exp %117 : vector<8x128xf32>
    %cst_85 = arith.constant 1.000000e+00 : f32
    %119 = vector.broadcast %cst_85 : f32 to vector<8x128xf32>
    %120 = arith.addf %119, %118 : vector<8x128xf32>
    %121 = arith.divf %119, %120 : vector<8x128xf32>
    %c8_86 = arith.constant 8 : index
    %c256_87 = arith.constant 256 : index
    %122 = vector.load %arg10[%c8_86, %c256_87] : memref<16x512xf32, #tpu.memory_space<vmem>>, vector<8x128xf32>
    tpu.vector_store %arg10[%c8_86, %c256_87], %121 {strides = array<i32>} : memref<16x512xf32, #tpu.memory_space<vmem>>, vector<8x128xf32>,
    %c0_88 = arith.constant 0 : index
    %c384_89 = arith.constant 384 : index
    %123 = vector.load %arg2[%c0_88, %c384_89] : memref<32x512xbf16, #tpu.memory_space<vmem>>, vector<32x128xbf16>
    %cst_90 = arith.constant dense<0.000000e+00> : vector<8x128xf32>
    %124 = tpu.matmul %92, %123, %cst_90 {dimension_numbers = #tpu.dot_dimension_numbers<[1], [0], [0], [1], [0, 0, 1, 1], [], []>} : vector<8x32xbf16>, vector<32x128xbf16>, vector<8x128xf32> -> vector<8x128xf32>
    %c0_91 = arith.constant 0 : index
    %c384_92 = arith.constant 384 : index
    %125 = vector.load %arg3[%c0_91, %c384_92] : memref<1x512xf32, #tpu.memory_space<vmem>>, vector<1x128xf32>
    %126 = vector.broadcast %125 : vector<1x128xf32> to vector<8x128xf32>
    %127 = arith.addf %124, %126 : vector<8x128xf32>
    %cst_93 = arith.constant 0.000000e+00 : f32
    %128 = vector.broadcast %cst_93 : f32 to vector<8x128xf32>
    %129 = arith.maximumf %127, %128 : vector<8x128xf32>
    %130 = arith.truncf %129 : vector<8x128xf32> to vector<8x128xbf16>
    %c0_94 = arith.constant 0 : index
    %c0_95 = arith.constant 0 : index
    %131 = vector.load %arg4[%c0_94, %c0_95] : memref<128x128xbf16, #tpu.memory_space<vmem>>, vector<128x128xbf16>
    %cst_96 = arith.constant dense<0.000000e+00> : vector<8x128xf32>
    %132 = tpu.matmul %130, %131, %cst_96 {dimension_numbers = #tpu.dot_dimension_numbers<[1], [0], [0], [1], [0, 0, 1, 1], [], []>} : vector<8x128xbf16>, vector<128x128xbf16>, vector<8x128xf32> -> vector<8x128xf32>
    %c0_97 = arith.constant 0 : index
    %c0_98 = arith.constant 0 : index
    %133 = vector.load %arg5[%c0_97, %c0_98] : memref<1x128xf32, #tpu.memory_space<vmem>>, vector<1x128xf32>
    %134 = vector.broadcast %133 : vector<1x128xf32> to vector<8x128xf32>
    %135 = arith.addf %132, %134 : vector<8x128xf32>
    %cst_99 = arith.constant 0.000000e+00 : f32
    %136 = vector.broadcast %cst_99 : f32 to vector<8x128xf32>
    %137 = arith.maximumf %135, %136 : vector<8x128xf32>
    %138 = arith.truncf %137 : vector<8x128xf32> to vector<8x128xbf16>
    %c0_100 = arith.constant 0 : index
    %c0_101 = arith.constant 0 : index
    %139 = vector.load %arg6[%c0_100, %c0_101] : memref<128x128xbf16, #tpu.memory_space<vmem>>, vector<128x128xbf16>
    %cst_102 = arith.constant dense<0.000000e+00> : vector<8x128xf32>
    %140 = tpu.matmul %138, %139, %cst_102 {dimension_numbers = #tpu.dot_dimension_numbers<[1], [0], [0], [1], [0, 0, 1, 1], [], []>} : vector<8x128xbf16>, vector<128x128xbf16>, vector<8x128xf32> -> vector<8x128xf32>
    %c0_103 = arith.constant 0 : index
    %c0_104 = arith.constant 0 : index
    %141 = vector.load %arg7[%c0_103, %c0_104] : memref<1x128xf32, #tpu.memory_space<vmem>>, vector<1x128xf32>
    %142 = vector.broadcast %141 : vector<1x128xf32> to vector<8x128xf32>
    %143 = arith.addf %140, %142 : vector<8x128xf32>
    %144 = arith.negf %143 : vector<8x128xf32>
    %145 = math.exp %144 : vector<8x128xf32>
    %cst_105 = arith.constant 1.000000e+00 : f32
    %146 = vector.broadcast %cst_105 : f32 to vector<8x128xf32>
    %147 = arith.addf %146, %145 : vector<8x128xf32>
    %148 = arith.divf %146, %147 : vector<8x128xf32>
    %c8_106 = arith.constant 8 : index
    %c384_107 = arith.constant 384 : index
    %149 = vector.load %arg10[%c8_106, %c384_107] : memref<16x512xf32, #tpu.memory_space<vmem>>, vector<8x128xf32>
    tpu.vector_store %arg10[%c8_106, %c384_107], %148 {strides = array<i32>} : memref<16x512xf32, #tpu.memory_space<vmem>>, vector<8x128xf32>,
    %c0_108 = arith.constant 0 : index
    %c0_109 = arith.constant 0 : index
    %150 = vector.load %arg8[%c0_108, %c0_109] : memref<32x384xbf16, #tpu.memory_space<vmem>>, vector<32x128xbf16>
    %cst_110 = arith.constant dense<0.000000e+00> : vector<4x128xf32>
    %151 = tpu.matmul %94, %150, %cst_110 {dimension_numbers = #tpu.dot_dimension_numbers<[1], [0], [0], [1], [0, 0, 1, 1], [], []>} : vector<4x32xbf16>, vector<32x128xbf16>, vector<4x128xf32> -> vector<4x128xf32>
    %c0_111 = arith.constant 0 : index
    %c0_112 = arith.constant 0 : index
    %152 = vector.load %arg9[%c0_111, %c0_112] : memref<1x384xf32, #tpu.memory_space<vmem>>, vector<1x128xf32>
    %153 = vector.broadcast %152 : vector<1x128xf32> to vector<4x128xf32>
    %154 = arith.addf %151, %153 : vector<4x128xf32>
    %c4 = arith.constant 4 : index
    %c0_113 = arith.constant 0 : index
    %155 = vector.load %arg11[%c4, %c0_113] : memref<8x384xf32, #tpu.memory_space<vmem>>, vector<4x128xf32>
    tpu.vector_store %arg11[%c4, %c0_113], %154 {strides = array<i32>} : memref<8x384xf32, #tpu.memory_space<vmem>>, vector<4x128xf32>,
    %c0_114 = arith.constant 0 : index
    %c128_115 = arith.constant 128 : index
    %156 = vector.load %arg8[%c0_114, %c128_115] : memref<32x384xbf16, #tpu.memory_space<vmem>>, vector<32x128xbf16>
    %cst_116 = arith.constant dense<0.000000e+00> : vector<4x128xf32>
    %157 = tpu.matmul %94, %156, %cst_116 {dimension_numbers = #tpu.dot_dimension_numbers<[1], [0], [0], [1], [0, 0, 1, 1], [], []>} : vector<4x32xbf16>, vector<32x128xbf16>, vector<4x128xf32> -> vector<4x128xf32>
    %c0_117 = arith.constant 0 : index
    %c128_118 = arith.constant 128 : index
    %158 = vector.load %arg9[%c0_117, %c128_118] : memref<1x384xf32, #tpu.memory_space<vmem>>, vector<1x128xf32>
    %159 = vector.broadcast %158 : vector<1x128xf32> to vector<4x128xf32>
    %160 = arith.addf %157, %159 : vector<4x128xf32>
    %161 = arith.negf %160 : vector<4x128xf32>
    %162 = math.exp %161 : vector<4x128xf32>
    %cst_119 = arith.constant 1.000000e+00 : f32
    %163 = vector.broadcast %cst_119 : f32 to vector<4x128xf32>
    %164 = arith.addf %163, %162 : vector<4x128xf32>
    %165 = arith.divf %163, %164 : vector<4x128xf32>
    %c4_120 = arith.constant 4 : index
    %c128_121 = arith.constant 128 : index
    %166 = vector.load %arg11[%c4_120, %c128_121] : memref<8x384xf32, #tpu.memory_space<vmem>>, vector<4x128xf32>
    tpu.vector_store %arg11[%c4_120, %c128_121], %165 {strides = array<i32>} : memref<8x384xf32, #tpu.memory_space<vmem>>, vector<4x128xf32>,
    %c0_122 = arith.constant 0 : index
    %c256_123 = arith.constant 256 : index
    %167 = vector.load %arg8[%c0_122, %c256_123] : memref<32x384xbf16, #tpu.memory_space<vmem>>, vector<32x128xbf16>
    %cst_124 = arith.constant dense<0.000000e+00> : vector<4x128xf32>
    %168 = tpu.matmul %94, %167, %cst_124 {dimension_numbers = #tpu.dot_dimension_numbers<[1], [0], [0], [1], [0, 0, 1, 1], [], []>} : vector<4x32xbf16>, vector<32x128xbf16>, vector<4x128xf32> -> vector<4x128xf32>
    %c0_125 = arith.constant 0 : index
    %c256_126 = arith.constant 256 : index
    %169 = vector.load %arg9[%c0_125, %c256_126] : memref<1x384xf32, #tpu.memory_space<vmem>>, vector<1x128xf32>
    %170 = vector.broadcast %169 : vector<1x128xf32> to vector<4x128xf32>
    %171 = arith.addf %168, %170 : vector<4x128xf32>
    %172 = arith.negf %171 : vector<4x128xf32>
    %173 = math.exp %172 : vector<4x128xf32>
    %cst_127 = arith.constant 1.000000e+00 : f32
    %174 = vector.broadcast %cst_127 : f32 to vector<4x128xf32>
    %175 = arith.addf %174, %173 : vector<4x128xf32>
    %176 = arith.divf %174, %175 : vector<4x128xf32>
    %c4_128 = arith.constant 4 : index
    %c256_129 = arith.constant 256 : index
    %177 = vector.load %arg11[%c4_128, %c256_129] : memref<8x384xf32, #tpu.memory_space<vmem>>, vector<4x128xf32>
    tpu.vector_store %arg11[%c4_128, %c256_129], %176 {strides = array<i32>} : memref<8x384xf32, #tpu.memory_space<vmem>>, vector<4x128xf32>,
    return
  }
  func.func @transform_0(%arg0: i32) -> (i32, i32, i32) {
    %c0_i32 = arith.constant 0 : i32
    %c0_i32_0 = arith.constant 0 : i32
    %c0_i32_1 = arith.constant 0 : i32
    return %arg0, %c0_i32, %c0_i32_0 : i32, i32, i32
  }
  func.func @transform_1(%arg0: i32) -> (i32, i32) {
    %c0_i32 = arith.constant 0 : i32
    %c0_i32_0 = arith.constant 0 : i32
    %c0_i32_1 = arith.constant 0 : i32
    return %c0_i32, %c0_i32_0 : i32, i32
  }
  func.func @transform_2(%arg0: i32) -> (i32, i32) {
    %c0_i32 = arith.constant 0 : i32
    %c0_i32_0 = arith.constant 0 : i32
    %c0_i32_1 = arith.constant 0 : i32
    return %c0_i32, %c0_i32_0 : i32, i32
  }
  func.func @transform_3(%arg0: i32) -> (i32, i32) {
    %c0_i32 = arith.constant 0 : i32
    %c0_i32_0 = arith.constant 0 : i32
    %c0_i32_1 = arith.constant 0 : i32
    return %c0_i32, %c0_i32_0 : i32, i32
  }
  func.func @transform_4(%arg0: i32) -> (i32, i32) {
    %c0_i32 = arith.constant 0 : i32
    %c0_i32_0 = arith.constant 0 : i32
    %c0_i32_1 = arith.constant 0 : i32
    return %c0_i32, %c0_i32_0 : i32, i32
  }
  func.func @transform_5(%arg0: i32) -> (i32, i32) {
    %c0_i32 = arith.constant 0 : i32
    %c0_i32_0 = arith.constant 0 : i32
    %c0_i32_1 = arith.constant 0 : i32
    return %c0_i32, %c0_i32_0 : i32, i32
  }
  func.func @transform_6(%arg0: i32) -> (i32, i32) {
    %c0_i32 = arith.constant 0 : i32
    %c0_i32_0 = arith.constant 0 : i32
    %c0_i32_1 = arith.constant 0 : i32
    return %c0_i32, %c0_i32_0 : i32, i32
  }
  func.func @transform_7(%arg0: i32) -> (i32, i32) {
    %c0_i32 = arith.constant 0 : i32
    %c0_i32_0 = arith.constant 0 : i32
    %c0_i32_1 = arith.constant 0 : i32
    return %c0_i32, %c0_i32_0 : i32, i32
  }
  func.func @transform_8(%arg0: i32) -> (i32, i32) {
    %c0_i32 = arith.constant 0 : i32
    %c0_i32_0 = arith.constant 0 : i32
    %c0_i32_1 = arith.constant 0 : i32
    return %c0_i32, %c0_i32_0 : i32, i32
  }
  func.func @transform_9(%arg0: i32) -> (i32, i32) {
    %c0_i32 = arith.constant 0 : i32
    %c0_i32_0 = arith.constant 0 : i32
    return %arg0, %c0_i32 : i32, i32
  }
  func.func @transform_10(%arg0: i32) -> (i32, i32) {
    %c0_i32 = arith.constant 0 : i32
    %c0_i32_0 = arith.constant 0 : i32
    return %arg0, %c0_i32 : i32, i32
  }
}

</mosaic_0001>

<bundles_post_ra>
// kernel: tpu_custom_call.1
= control target key start
LH: loop header
LB: loop body
LE: loop exit
PB: predicated region body
PF: predicated region fallthrough
CT: control target
= control target key end

     0   :  { %s3299_s0 = inlined_call_operand.vmem [shape: f32[4,12,32], index: 0, kind: input, shape index: {}]   ;;  %s3300_s1 = inlined_call_operand.vmem [shape: bf16[32,512], index: 1, kind: input, shape index: {}]   ;;  %s3301_s2 = inlined_call_operand.hbm [shape: f32[1,512], index: 2, kind: input, shape index: {}]   ;;  %s3302_s3 = inlined_call_operand.hbm [shape: bf16[128,128], index: 3, kind: input, shape index: {}]   ;;  %s3303_s4 = inlined_call_operand.vmem [shape: f32[1,128], index: 4, kind: input, shape index: {}]   ;;  %s3304_s5 = inlined_call_operand.hbm [shape: bf16[128,128], index: 5, kind: input, shape index: {}]   ;;  %s3305_s6 = inlined_call_operand.vmem [shape: f32[1,128], index: 6, kind: input, shape index: {}]   ;;  %s3306_s7 = inlined_call_operand.vmem [shape: bf16[32,384], index: 7, kind: input, shape index: {}]   ;;  %s3307_s8 = inlined_call_operand.vmem [shape: f32[1,384], index: 8, kind: input, shape index: {}]   ;;  %s3308_s9 = inlined_call_operand.hbm [shape: f32[32,512], index: 9, kind: output, shape index: {0}]   ;;  %s3309_s10 = inlined_call_operand.hbm [shape: f32[16,384], index: 10, kind: output, shape index: {1}]  }
   0x1   :  { %3312 = sst [smem:[#allocation16_spill]] %s3299_s0 }
   0x2   :  { %3313 = sst [smem:[#allocation17_spill]] %s3300_s1 }
   0x3   :  { %3314 = sst [smem:[#allocation18_spill]] %s3301_s2 }
   0x4   :  { %3315 = sst [smem:[#allocation19_spill]] %s3302_s3 }
   0x5   :  { %16 = vsyncpa [#allocation3], 0 }
   0x6   :  { %17 = vsyncpa [#allocation6], 0 }
   0x7   :  { %18 = vsyncpa [#allocation4], 0 }
   0x8   :  { %20 = vsyncpa [#allocation4 + $0x1], 0 }
   0x9   :  { %21 = vsyncpa [#allocation10], 0 }
   0xa   :  { %23 = vsyncpa [#allocation10 + $0x1], 0  ;;  %s2841_s13 = smov 0   ;;  %s2843_s14 = smov 0  }
   0xb   :  { %s2845_s15 = smov 0   ;;  %s2847_s16 = smov 0  }
   0xc LB: > { %s2862_s17 = sadd.s32 4294967295, %s2773_s16   ;;  %s2016_s18 = sadd.s32 4294967294, %s2773_s16   ;;  %s2773_s16 = sphi %s2847_s16, %s3336_s16   ;;  %s2769_s15 = sphi %s2845_s15, %s3335_s15   ;;  %s2765_s14 = sphi %s2843_s14, %s3334_s14   ;;  %s2761_s13 = sphi %s2841_s13, %s3333_s13  }
   0xd   : > { %s2866_s19 = sadd.s32 1, %s2773_s16   ;;  %s230_s20 = sadd.s32 1, %s2769_s15 }
   0xe   : > { %s227_s21 = ssub.s32 %s2773_s16, %s2866_s19  ;;  %p240_p0 = scmp.ne.s32.totalorder %s2769_s15, %s2765_s14 }
   0xf   : > { %p228_p1 = scmp.eq.s32.totalorder %s227_s21, 0  ;;  %p241_p2 = scmp.eq.s32.totalorder %s2862_s17, 1 }
  0x10   : > { %p246_p3 = scmp.ne.s32.totalorder %s2765_s14, %s2761_s13  ;;  %p247_p4 = scmp.eq.s32.totalorder %s2016_s18, 1 }
  0x11   : > { %s2877_s22 = scalar_select %p228_p1, %s2769_s15, %s230_s20  }
  0x12   : > { %p2879_p5 = por %p241_p2, %p240_p0  ;;  %p2883_p6 = por %p247_p4, %p246_p3 }
  0x13   : > { %3316 = sst [smem:[#allocation15_spill]] %s2877_s22  ;;  %p2017_p7 = scmp.ge.s32.totalorder %s2773_s16, 1 }
  0x14   : > { %s3317_s23 = scalar_select %p2879_p5, 1, 0 }
  0x15   : > { %s3318_s24 = scalar_select %p2883_p6, 1, 0 }
  0x16   : > { %p280_p8 = scmp.lt.s32.totalorder %s2773_s16, 3  ;;  %p3310_p9 = scmp.eq.s32.totalorder %s2862_s17, 0 }
  0x17   : > { %s2775_s26 = smov [#allocation5]   ;;  %s2776_s29 = smov [#allocation2]  }
  0x18   : > { %p2890_p10 = pnand %p2017_p7, %p280_p8  ;;  %s306_s27 = sshll.u32 %s2775_s26, 4  ;;  %s307_s27 = int_to_ptr.vmem [resolvable:$true] %s306_s27 }
  0x19   : > { %s296_s30 = sshll.u32 %s2776_s29, 4  ;;  %s2777_s11 = smov [#allocation7]   ;;  %s297_s30 = int_to_ptr.vmem [resolvable:$true] %s296_s30 }
  0x1a   : > { %p2432_p11 = pneg %p2890_p10  ;;  %s322_s12 = sshll.u32 %s2777_s11, 4  ;;  %s323_s12 = int_to_ptr.vmem [resolvable:$true] %s322_s12 }
  0x1b   : > { %s2608_s18 = scalar_lea.vmem %s307_s27, 1024  ;;  %p2616_p3 = scmp.lt.s32.totalorder %s307_s27, %s307_s27 }
  0x1c   : > { %p2898_p12 = pnand %p3310_p9, %p2432_p11  ;;  %p2609_p0 = scmp.ne.s32.totalorder %s307_s27, %s2608_s18 }
  0x1d   : > { %p2617_p4 = scmp.lt.s32.totalorder %s2608_s18, %s2608_s18 }
  0x1e   : > { %p2599_p13 = pneg %p2898_p12 }
  0x1f   : > { %p2618_p7 = por %p2617_p4, %p2616_p3 }
  0x20   : > { %p2611_p1 = pnand %p2609_p0, %p2599_p13 }
  0x22   : > { %p2612_p2 = pneg %p2611_p1 }
  0x24   : > { %p2619_p8 = pnand %p2618_p7, %p2612_p2 }
  0x26   : > { %2622 = shalt.err (!%p2619_p8)
}
  0x27   : > { %s2778_s20 = smov 64   ;;  %s2779_s21 = smov 4  }
  0x28   : > { %s3321_s3 = sld [smem:[#allocation19_spill]]  ;;  %s2634_s11 = scalar_lea.vmem %s297_s30, 64 }
  0x29   : > { %p2635_p11 = scmp.ne.s32.totalorder %s297_s30, %s2634_s11  ;;  %p2642_p9 = scmp.lt.s32.totalorder %s297_s30, %s297_s30 }
  0x2a   : > { %p2643_p6 = scmp.lt.s32.totalorder %s2634_s11, %s2634_s11 }
  0x2b   : > { %p2637_p0 = pnand %p2635_p11, %p2599_p13 }
  0x2c   : > { %p2644_p3 = por %p2643_p6, %p2642_p9 }
  0x2d   : > { %p2638_p1 = pneg %p2637_p0 }
  0x2e   : > { %2438 = dma.hbm_to_vmem [thread:$0]  (!%p2898_p12), %s3321_s3, 1024, %s307_s27, [#allocation6], %s2778_s20, %s2778_s20, %s2779_s21  }
  0x2f   : > { %p2645_p2 = pnand %p2644_p3, %p2638_p1 }
  0x31   : > { %2648 = shalt.err (!%p2645_p2)
}
  0x32   : > { %s3322_s2 = sld [smem:[#allocation18_spill]]  ;;  %s2660_s27 = scalar_lea.vmem %s323_s12, 1024 }
  0x33   : > { %p2661_p4 = scmp.ne.s32.totalorder %s323_s12, %s2660_s27  ;;  %p2668_p11 = scmp.lt.s32.totalorder %s323_s12, %s323_s12 }
  0x34   : > { %p2669_p0 = scmp.lt.s32.totalorder %s2660_s27, %s2660_s27 }
  0x35   : > { %p2663_p7 = pnand %p2661_p4, %p2599_p13 }
  0x36   : > { %p2670_p5 = por %p2669_p0, %p2668_p11 }
  0x37   : > { %p2664_p8 = pneg %p2663_p7 }
  0x38   : > { %2435 = dma.hbm_to_vmem [thread:$0]  (!%p2898_p12), %s3322_s2, 64, %s297_s30, [#allocation3]  }
  0x39   : > { %p2671_p6 = pnand %p2670_p5, %p2664_p8 }
  0x3b   : > { %2674 = shalt.err (!%p2671_p6)
}
  0x3c   : > { %2441 = dma.hbm_to_vmem [thread:$0]  (!%p2898_p12), %s3304_s5, 1024, %s323_s12, [#allocation6], %s2778_s20, %s2778_s20, %s2779_s21  }
  0x3d   : > { %357 = sbr.rel (%p2890_p10) target bundleno = 1011 (0x3f3), region = 56  ;;  %p3323_p9 = scmp.eq.s32.totalorder (!%p2890_p10), %s2862_s17, 0 }
  0x42   : > { %2744 = dma.done.wait (%p3323_p9), [#allocation3], 64   ;;  %p3324_p13 = pmov %p3323_p9 }
  0x43   : > { %p3325_p1 = pmov %p3323_p9 }
  0x44   : > { %2746 = vsyncadd (%p3324_p13), [#allocation3], 4294967232 }
  0x45   : > { %2748 = dma.done.wait (%p3325_p1), [#allocation6], 2048   ;;  %p3326_p5 = pmov %p3325_p1 }
  0x46   : > { %s2027_s22 = sshll.u32 %s2862_s17, 1  ;;  %v2780_v0 = vmov 0.0   ;;  %vm2781_vm0 = vmmov 0   ;;  %s3327_s0 = sld [smem:[#allocation16_spill]]  ;;  %vm445_vm1 = vcmask 261120   ;;  %v2505_v11 = vld [vmem:[#allocation5 + $0x38] sm:$0xff]  }
  0x47   : > { %2750 = vsyncadd (%p3326_p5), [#allocation6], 4294965248  ;;  %2230 = vmatprep.subr.bf16.mxu1 %v2780_v0  ;;  %2234 = vmatprep.mubr.msk.bf16.mxu1 %vm2781_vm0, %v2780_v0  ;;  %p410_p10 = scmp.lt.s32.totalorder %s2027_s22, 3  ;;  %s3328_s1 = sld [smem:[#allocation17_spill]]  ;;  %v2506_v12 = vld [vmem:[#allocation5 + $0x30] sm:$0xff]   ;;  %v2507_v13 = vld [vmem:[#allocation5 + $0x28] sm:$0xff]  }
  0x48   : > { %2222 = vmatprep.subr.bf16.mxu0 %v2780_v0  ;;  %2226 = vmatprep.mubr.msk.bf16.mxu0 %vm2781_vm0, %v2780_v0  ;;  %v2508_v14 = vld [vmem:[#allocation5 + $0x20] sm:$0xff]   ;;  %v2509_v15 = vld [vmem:[#allocation5 + $0x18] sm:$0xff]   ;;  %v2510_v16 = vld [vmem:[#allocation5 + $0x10] sm:$0xff]   ;;  %s3014_s26 = sand.u32 1, %s2765_s14   ;;  %p3329_p3 = scmp.ne.s32.totalorder %s3317_s23, 0 }
  0x49   : > { %s3338_s22 = smov (!%p410_p10, %s2027_s22), 3  ;;  %v2511_v17 = vld [vmem:[#allocation5 + $0x8] sm:$0xff]   ;;  %v2512_v18 = vld [vmem:[#allocation5] sm:$0xff]   ;;  %v2521_v19 = vld [vmem:[#allocation7 + $0x38] sm:$0xff]   ;;  %s2026_s29 = sshll.u32 %s3014_s26, 6 }
  0x4a   : > { %s2141_s25 = sshll.u32 %s3338_s22, 4  ;;  %v2522_v20 = vld [vmem:[#allocation7 + $0x30] sm:$0xff]   ;;  %v2523_v21 = vld [vmem:[#allocation7 + $0x28] sm:$0xff]   ;;  %v2524_v22 = vld [vmem:[#allocation7 + $0x20] sm:$0xff]   ;;  %s3022_s22 = scalar_lea.vmem [#allocation8], %s2026_s29 }
  0x4b   : > { %v2525_v23 = vld [vmem:[#allocation7 + $0x18] sm:$0xff]   ;;  %v2526_v24 = vld [vmem:[#allocation7 + $0x10] sm:$0xff]   ;;  %v2527_v25 = vld [vmem:[#allocation7 + $0x8] sm:$0xff]   ;;  %s2414_s30 = smul.u32 24, %s3014_s26  ;;  %s1877_s29 = sshll.u32 %s3022_s22, 4  ;;  %s3232_s29 = int_to_ptr.vmem [resolvable:$true] %s1877_s29 }
  0x4c   : > { %s2948_s12 = scalar_lea.vmem %s3327_s0, %s2141_s25  ;;  %v3010_v26 = vld [vmem:[#allocation2 + $0x1] ss:$0 sm:$0xff]  ;;  %v3016_v31 = vld [vmem:[#allocation2] ss:$0 sm:$0xff]  ;;  %v3019_v35 = vld [vmem:[#allocation2 + $0x3] ss:$0 sm:$0xff] }
  0x4d   : > { %v2497_v1 = vld [vmem:[%s3328_s1 + $0x24] ss:$16 sps:$4 sm:$0xff]   ;;  %v2501_v5 = vld [vmem:[%s3328_s1 + $0x20] ss:$16 sps:$4 sm:$0xff]   ;;  %v2499_v6 = vld [vmem:[%s3328_s1 + $0x2c] ss:$16 sps:$4 sm:$0xff]  }
  0x4e   : > { %v2498_v2 = vld [vmem:[%s3328_s1 + $0x4] ss:$16 sps:$4 sm:$0xff]   ;;  %2231 = vmatpush3.bf16.msra.mxu1 %v2497_v1  ;;  %2223 = vmatpush3.bf16.msra.mxu0 %v2501_v5  ;;  %v2502_v7 = vld [vmem:[%s3328_s1] ss:$16 sps:$4 sm:$0xff]   ;;  %v2500_v8 = vld [vmem:[%s3328_s1 + $0xc] ss:$16 sps:$4 sm:$0xff]  }
  0x4f   : > { %v418_v3 = vld [vmem:[%s2948_s12] sm:$0xff]  ;;  %2232 = vmatprep.subr.bf16.mxu1 %v2780_v0  ;;  %2224 = vmatprep.subr.bf16.mxu0 %v2780_v0  ;;  %v2503_v9 = vld [vmem:[%s3328_s1 + $0x28] ss:$16 sps:$4 sm:$0xff]   ;;  %s3110_s27 = scalar_lea.vmem [#allocation9], %s2414_s30  ;;  %s2143_s25 = sshll.u32 %s2862_s17, 10 }
  0x50   : > { %v420_v4 = vpack.c.bf16 %v418_v3, %v418_v3  ;;  %v2504_v10 = vld [vmem:[%s3328_s1 + $0x8] ss:$16 sps:$4 sm:$0xff]   ;;  %v3026_v44 = vld [vmem:[#allocation2 + $0x2] ss:$0 sm:$0xff]  ;;  %v2517_v62 = vld [vmem:[%s3328_s1 + $0x24] ss:$16 sps:$4 sm:$0xff]   ;;  %s3237_s30 = scalar_lea.hbm %s3308_s9, %s2143_s25 }
  0x51   : > { %v2513_v46 = vld [vmem:[%s3306_s7 + $0x18] ss:$12 sps:$4 sm:$0xff]   ;;  %v2514_v52 = vld [vmem:[%s3306_s7] ss:$12 sps:$4 sm:$0xff]   ;;  %v419_v53 = vld [vmem:[%s2948_s12 + $0x8] sm:$0xf] }
  0x52   : > { %2233 = vmatpush3.bf16.msra.mxu1 %v2498_v2  ;;  %2225 = vmatpush3.bf16.msra.mxu0 %v2502_v7  ;;  %v3039_v58 = vpack.c.bf16 %v419_v53, %v419_v53  ;;  %v2515_v60 = vld [vmem:[%s3306_s7 + $0x20] ss:$12 sps:$4 sm:$0xff]   ;;  %v2516_v61 = vld [vmem:[%s3306_s7 + $0x8] ss:$12 sps:$4 sm:$0xff]   ;;  %s2675_s11 = scalar_lea.vmem %s3232_s29, 1024  ;;  %s2782_s18 = smov [#allocation8]  }
  0x53   : > { %2246 = vmatprep.subr.bf16.mxu1 %v2780_v0  ;;  %2238 = vmatprep.subr.bf16.mxu0 %v2780_v0  ;;  %v2518_v1 = vld [vmem:[%s3328_s1 + $0x4] ss:$16 sps:$4 sm:$0xff]   ;;  %v2520_v7 = vld [vmem:[%s3328_s1 + $0xc] ss:$16 sps:$4 sm:$0xff]   ;;  %p2676_p12 = scmp.ne.s32.totalorder %s3232_s29, %s2675_s11 }
  0x54   : > { %v2081_v2 = vld [vmem:[%s2948_s12 + $0x10] sm:$0xff] }
  0x55   : > { %2235 = vmatmul.mubr.msk.bf16.vlgmr.msra.gmra.mxu1 %vm445_vm1, %v420_v4  ;;  %2227 = vmatmul.mubr.msk.bf16.vlgmr.msra.gmra.mxu0 %vm445_vm1, %v420_v4  ;;  %v3066_v5 = vpack.c.bf16 %v2081_v2, %v2081_v2  ;;  %p2677_p2 = pnand %p2676_p12, %p3329_p3 }
  0x56   : > { %2247 = vmatpush3.bf16.msra.mxu1 %v2499_v6  ;;  %2250 = vmatprep.mubr.msk.bf16.mxu1 %vm2781_vm0, %v2780_v0  ;;  %v2519_v6 = vld [vmem:[%s3328_s1 + $0x2c] ss:$16 sps:$4 sm:$0xff]  }
  0x57   : > { %2248 = vmatprep.subr.bf16.mxu1 %v2780_v0  ;;  %2239 = vmatpush3.bf16.msra.mxu0 %v2503_v9  ;;  %v2528_v9 = vld [vmem:[#allocation7] sm:$0xff]   ;;  %p2678_p4 = pneg %p2677_p2 }
  0x58   : > { %2242 = vmatprep.mubr.msk.bf16.mxu0 %vm2781_vm0, %v2780_v0  ;;  %2240 = vmatprep.subr.bf16.mxu0 %v2780_v0 }
  0x5a   : > { %2249 = vmatpush3.bf16.msra.mxu1 %v2500_v8 }
  0x5b   : > { %2274 = vmatprep.subr.bf16.mxu1 %v2780_v0  ;;  %2241 = vmatpush3.bf16.msra.mxu0 %v2504_v10  ;;  %v3091_v10 = vld [vmem:[%s3303_s4] ss:$0 sm:$0xff] }
  0x5c   : > { %2254 = vmatprep.subr.bf16.mxu0 %v2780_v0 }
  0x5d   : > { %2251 = vmatmul.mubr.msk.bf16.vlgmr.msra.gmra.mxu1 %vm445_vm1, %v420_v4 }
  0x5e   : > { %2290 = vmatprep.mubr.msk.bf16.mxu1 %vm2781_vm0, %v2780_v0  ;;  %2243 = vmatmul.mubr.msk.bf16.vlgmr.msra.gmra.mxu0 %vm445_vm1, %v420_v4 }
  0x5f   : > { %2255 = vmatpush3.bf16.msra.mxu0 %v2505_v11  ;;  %2270 = vmatprep.mubr.msk.bf16.mxu0 %vm2781_vm0, %v2780_v0 }
  0x60   : > { %2256 = vmatprep.subr.bf16.mxu0 %v2780_v0  ;;  %2275 = vmatpush3.bf16.msra.mxu1 %v2521_v19  ;;  %v3101_v19 = vld [vmem:[%s3307_s8] ss:$0 sm:$0xff] }
  0x61   : > { %2276 = vmatprep.subr.bf16.mxu1 %v2780_v0 }
  0x63   : > { %2257 = vmatpush3.bf16.msra.mxu0 %v2506_v12 }
  0x64   : > { %2258 = vmatprep.subr.bf16.mxu0 %v2780_v0  ;;  %2277 = vmatpush3.bf16.msra.mxu1 %v2522_v20  ;;  %v2530_v20 = vld [vmem:[%s3306_s7 + $0x4] ss:$12 sps:$4 sm:$0xff]  }
  0x65   : > { %2278 = vmatprep.subr.bf16.mxu1 %v2780_v0 }
  0x67   : > { %2259 = vmatpush3.bf16.msra.mxu0 %v2507_v13 }
  0x68   : > { %2260 = vmatprep.subr.bf16.mxu0 %v2780_v0  ;;  %2279 = vmatpush3.bf16.msra.mxu1 %v2523_v21 }
  0x69   : > { %2280 = vmatprep.subr.bf16.mxu1 %v2780_v0 }
  0x6b   : > { %2261 = vmatpush3.bf16.msra.mxu0 %v2508_v14 }
  0x6c   : > { %2262 = vmatprep.subr.bf16.mxu0 %v2780_v0  ;;  %2281 = vmatpush3.bf16.msra.mxu1 %v2524_v22 }
  0x6d   : > { %2282 = vmatprep.subr.bf16.mxu1 %v2780_v0 }
  0x6f   : > { %2263 = vmatpush3.bf16.msra.mxu0 %v2509_v15 }
  0x70   : > { %2264 = vmatprep.subr.bf16.mxu0 %v2780_v0  ;;  %2283 = vmatpush3.bf16.msra.mxu1 %v2525_v23 }
  0x71   : > { %2284 = vmatprep.subr.bf16.mxu1 %v2780_v0 }
  0x73   : > { %2265 = vmatpush3.bf16.msra.mxu0 %v2510_v16  ;;  %v2529_v16 = vld [vmem:[%s3306_s7 + $0x1c] ss:$12 sps:$4 sm:$0xff]  }
  0x74   : > { %2266 = vmatprep.subr.bf16.mxu0 %v2780_v0  ;;  %2285 = vmatpush3.bf16.msra.mxu1 %v2526_v24  ;;  %v2531_v24 = vld [vmem:[%s3328_s1 + $0x20] ss:$16 sps:$4 sm:$0xff]  }
  0x75   : > { %2286 = vmatprep.subr.bf16.mxu1 %v2780_v0 }
  0x77   : > { %2267 = vmatpush3.bf16.msra.mxu0 %v2511_v17 }
  0x78   : > { %2268 = vmatprep.subr.bf16.mxu0 %v2780_v0  ;;  %2287 = vmatpush3.bf16.msra.mxu1 %v2527_v25 }
  0x79   : > { %2288 = vmatprep.subr.bf16.mxu1 %v2780_v0 }
  0x7b   : > { %2269 = vmatpush3.bf16.msra.mxu0 %v2512_v18 }
  0x7c   : > { %2294 = vmatprep.subr.bf16.mxu0 %v2780_v0  ;;  %2289 = vmatpush3.bf16.msra.mxu1 %v2528_v9  ;;  %v2549_v9 = vld [vmem:[#allocation7 + $0x10] sm:$0xff]  }
  0x7d   : > { %2302 = vmatprep.subr.bf16.mxu1 %v2780_v0 }
 0x115   : > { %v547_v27 = vpop.f32.mrf.mxu1  ;;  %v483_v33 = vpop.f32.mrf.mxu0 }
 0x116   : > { %v548_v28 = vadd.f32 %v3010_v26, %v547_v27  ;;  %v484_v36 = vadd.f32 %v3016_v31, %v483_v33 }
 0x117   : > { %v2236_v29 = vpop.f32.mrf.mxu1  ;;  %v2228_v37 = vpop.f32.mrf.mxu0 }
 0x118   : > { %v2038_v30 = vmul.f32 -1.442695, %v548_v28  ;;  %489 = vst [vmem:[%s3022_s22] sm:$0xff] %v484_v36  ;;  %v3120_v28 = vld [vmem:[%s3307_s8 + $0x2] ss:$0 sm:$0xff]  ;;  %v2533_v36 = vld [vmem:[%s3328_s1 + $0x28] ss:$16 sps:$4 sm:$0xff]  }
 0x119   : > { %v550_v32 = vpop.f32.mrf.mxu1  ;;  %v486_v40 = vpop.f32.mrf.mxu0  ;;  %v2532_v29 = vld [vmem:[%s3328_s1] ss:$16 sps:$4 sm:$0xff]  }
 0x11a   : > { %2557 = vpow2.f32 %v2038_v30 }
 0x11b   : > { %v2237_v34 = vpop.f32.mrf.mxu1  ;;  %v2229_v43 = vpop.f32.mrf.mxu0 }
 0x11d   : > { %v687_v38 = vpop.f32.mrf.mxu1 }
 0x11e   : > { %v688_v39 = vadd.f32 %v3019_v35, %v687_v38  ;;  %v617_v48 = vpop.f32.mrf.mxu0 }
 0x11f   : > { %v2252_v41 = vpop.f32.mrf.mxu1  ;;  %v618_v50 = vadd.f32 %v3026_v44, %v617_v48  ;;  %v2536_v48 = vld [vmem:[#allocation5 + $0x30] sm:$0xff]  }
 0x120   : > { %v693_v42 = vmax.f32 %v688_v39, 0.0  ;;  %v2244_v51 = vpop.f32.mrf.mxu0  ;;  %v2534_v39 = vld [vmem:[%s3328_s1 + $0x8] ss:$16 sps:$4 sm:$0xff]  }
 0x121   : > { %v690_v45 = vpop.f32.mrf.mxu1  ;;  %v2043_v54 = vmul.f32 -1.442695, %v618_v50 }
 0x122   : > { %v694_v47 = vpack.c.bf16 %v693_v42, %v693_v42  ;;  %v620_v55 = vpop.f32.mrf.mxu0  ;;  %v2535_v45 = vld [vmem:[#allocation5 + $0x38] sm:$0xff]  }
 0x123   : > { %v2253_v49 = vpop.f32.mrf.mxu1  ;;  %2559 = vpow2.f32 %v2043_v54  ;;  %v2538_v55 = vld [vmem:[#allocation5 + $0x20] sm:$0xff]  }
 0x124   : > { %2271 = vmatmul.mubr.bf16.vlgmr.msra.gmra.mxu0 %v694_v47  ;;  %v2245_v59 = vpop.f32.mrf.mxu0 }
 0x125   : > { %2295 = vmatpush3.bf16.msra.mxu0 %v2513_v46  ;;  %2298 = vmatprep.mubr.msk.bf16.mxu0 %vm2781_vm0, %v2780_v0  ;;  %v2540_v59 = vld [vmem:[#allocation5 + $0x10] sm:$0xff]  }
 0x126   : > { %2296 = vmatprep.subr.bf16.mxu0 %v2780_v0 }
 0x127   : > { %v2558_v56 = vpop.eup %2557 }
 0x128   : > { %v556_v57 = vadd.f32 1.0, %v2558_v56 }
 0x129   : > { %2297 = vmatpush3.bf16.msra.mxu0 %v2514_v52  ;;  %v2537_v52 = vld [vmem:[#allocation5 + $0x28] sm:$0xff]  }
 0x12a   : > { %2561 = vrcp.f32 %v556_v57  ;;  %2310 = vmatprep.subr.bf16.mxu0 %v2780_v0 }
 0x12c   : > { %2299 = vmatmul.mubr.msk.bf16.vlgmr.msra.gmra.mxu0 %vm445_vm1, %v3039_v58 }
 0x12d   : > { %2311 = vmatpush3.bf16.msra.mxu0 %v2515_v60  ;;  %2314 = vmatprep.mubr.msk.bf16.mxu0 %vm2781_vm0, %v2780_v0 }
 0x12e   : > { %2312 = vmatprep.subr.bf16.mxu0 %v2780_v0 }
 0x130   : > { %v2560_v63 = vpop.eup %2559 }
 0x131   : > { %2313 = vmatpush3.bf16.msra.mxu0 %v2516_v61  ;;  %v626_v3 = vadd.f32 1.0, %v2560_v63 }
 0x132   : > { %2326 = vmatprep.subr.bf16.mxu0 %v2780_v0 }
 0x133   : > { %2563 = vrcp.f32 %v626_v3 }
 0x134   : > { %2315 = vmatmul.mubr.msk.bf16.vlgmr.msra.gmra.mxu0 %vm445_vm1, %v3039_v58 }
 0x135   : > { %2327 = vmatpush3.bf16.msra.mxu0 %v2517_v62  ;;  %2330 = vmatprep.mubr.msk.bf16.mxu0 %vm2781_vm0, %v2780_v0  ;;  %v2541_v62 = vld [vmem:[#allocation5 + $0x8] sm:$0xff]  }
 0x136   : > { %2328 = vmatprep.subr.bf16.mxu0 %v2780_v0 }
 0x137   : > { %v2562_v4 = vpop.eup %2561 }
 0x138   : > { %559 = vst [vmem:[%s3022_s22 + $0x8] sm:$0xff] %v2562_v4  ;;  %v2544_v4 = vld [vmem:[#allocation7 + $0x30] sm:$0xff]  }
 0x139   : > { %2329 = vmatpush3.bf16.msra.mxu0 %v2518_v1  ;;  %v2542_v1 = vld [vmem:[#allocation5] sm:$0xff]  }
 0x13a   : > { %2342 = vmatprep.subr.bf16.mxu0 %v2780_v0 }
 0x13c   : > { %2331 = vmatmul.mubr.msk.bf16.vlgmr.msra.gmra.mxu0 %vm445_vm1, %v3066_v5 }
 0x13d   : > { %2343 = vmatpush3.bf16.msra.mxu0 %v2519_v6  ;;  %2346 = vmatprep.mubr.msk.bf16.mxu0 %vm2781_vm0, %v2780_v0  ;;  %v2546_v6 = vld [vmem:[#allocation7 + $0x20] sm:$0xff]  }
 0x13e   : > { %2344 = vmatprep.subr.bf16.mxu0 %v2780_v0 }
 0x140   : > { %v2564_v8 = vpop.eup %2563 }
 0x141   : > { %2345 = vmatpush3.bf16.msra.mxu0 %v2520_v7  ;;  %629 = vst [vmem:[%s3022_s22 + $0x10] sm:$0xff] %v2564_v8  ;;  %v2547_v7 = vld [vmem:[#allocation7 + $0x18] sm:$0xff]   ;;  %v2548_v8 = vld [vmem:[%s3306_s7 + $0x18] ss:$12 sps:$4 sm:$0xff]  }
 0x142   : > { %2370 = vmatprep.subr.bf16.mxu0 %v2780_v0 }
 0x144   : > { %2347 = vmatmul.mubr.msk.bf16.vlgmr.msra.gmra.mxu0 %vm445_vm1, %v3066_v5 }
 0x145   : > { %2386 = vmatprep.mubr.msk.bf16.mxu0 %vm2781_vm0, %v2780_v0 }
 0x1e4   : > { %v800_v11 = vpop.f32.mrf.mxu0 }
 0x1e5   : > { %v801_v12 = vadd.f32 %v3091_v10, %v800_v11  ;;  %v2550_v11 = vld [vmem:[%s3306_s7] ss:$12 sps:$4 sm:$0xff]  }
 0x1e6   : > { %v2272_v13 = vpop.f32.mrf.mxu0 }
 0x1e7   : > { %v806_v14 = vmax.f32 %v801_v12, 0.0  ;;  %v2551_v12 = vld [vmem:[#allocation7 + $0x8] sm:$0xff]   ;;  %v2082_v13 = vld [vmem:[%s2948_s12 + $0x18] sm:$0xf]  ;;  %s2679_s12 = sshll.u32 %s2782_s18, 4  ;;  %s2680_s12 = int_to_ptr.vmem [resolvable:$false] %s2679_s12 }
 0x1e8   : > { %v803_v15 = vpop.f32.mrf.mxu0  ;;  %s2681_s0 = scalar_lea.vmem %s2680_s12, 2048  ;;  %p2682_p7 = scmp.lt.s32.totalorder %s3232_s29, %s2680_s12 }
 0x1e9   : > { %v807_v17 = vpack.c.bf16 %v806_v14, %v806_v14  ;;  %v3176_v14 = vpack.c.bf16 %v2082_v13, %v2082_v13  ;;  %v2552_v15 = vld [vmem:[%s3306_s7 + $0x20] ss:$12 sps:$4 sm:$0xff]   ;;  %p2683_p8 = scmp.lt.s32.totalorder %s2681_s0, %s2675_s11 }
 0x1ea   : > { %v2273_v18 = vpop.f32.mrf.mxu0 }
 0x1eb   : > { %2291 = vmatmul.mubr.bf16.vlgmr.msra.gmra.mxu1 %v807_v17  ;;  %v2554_v17 = vld [vmem:[%s3306_s7 + $0x8] ss:$12 sps:$4 sm:$0xff]   ;;  %v3197_v18 = vld [vmem:[%s3305_s6] ss:$0 sm:$0xff]  ;;  %p2684_p11 = por %p2683_p8, %p2682_p7 }
 0x1ec   : > { %2303 = vmatpush3.bf16.msra.mxu1 %v2529_v16  ;;  %2306 = vmatprep.mubr.msk.bf16.mxu1 %vm2781_vm0, %v2780_v0  ;;  %v986_v21 = vpop.f32.mrf.mxu0  ;;  %v2553_v16 = vld [vmem:[#allocation7] sm:$0xff]  }
 0x1ed   : > { %2304 = vmatprep.subr.bf16.mxu1 %v2780_v0  ;;  %v987_v22 = vadd.f32 %v3101_v19, %v986_v21  ;;  %p2685_p0 = pnand %p2684_p11, %p2678_p4 }
 0x1ee   : > { %v2300_v23 = vpop.f32.mrf.mxu0 }
 0x1ef   : > { %992 = vst [vmem:[%s3110_s27] sm:$0xf] %v987_v22 }
 0x1f0   : > { %2305 = vmatpush3.bf16.msra.mxu1 %v2530_v20  ;;  %v989_v25 = vpop.f32.mrf.mxu0 }
 0x1f1   : > { %2318 = vmatprep.subr.bf16.mxu1 %v2780_v0 }
 0x1f2   : > { %v2301_v27 = vpop.f32.mrf.mxu0 }
 0x1f3   : > { %2307 = vmatmul.mubr.msk.bf16.vlgmr.msra.gmra.mxu1 %vm445_vm1, %v3039_v58  ;;  %v2539_v58 = vld [vmem:[#allocation5 + $0x18] sm:$0xff]  }
 0x1f4   : > { %2319 = vmatpush3.bf16.msra.mxu1 %v2531_v24  ;;  %2322 = vmatprep.mubr.msk.bf16.mxu1 %vm2781_vm0, %v2780_v0  ;;  %v1120_v30 = vpop.f32.mrf.mxu0  ;;  %v3203_v27 = vld [vmem:[%s3307_s8 + $0x1] ss:$0 sm:$0xff] }
 0x1f5   : > { %2320 = vmatprep.subr.bf16.mxu1 %v2780_v0  ;;  %v1121_v32 = vadd.f32 %v3120_v28, %v1120_v30 }
 0x1f6   : > { %v2316_v33 = vpop.f32.mrf.mxu0 }
 0x1f7   : > { %v2080_v34 = vmul.f32 -1.442695, %v1121_v32 }
 0x1f8   : > { %2321 = vmatpush3.bf16.msra.mxu1 %v2532_v29  ;;  %v1123_v37 = vpop.f32.mrf.mxu0 }
 0x1f9   : > { %2334 = vmatprep.subr.bf16.mxu1 %v2780_v0  ;;  %2565 = vpow2.f32 %v2080_v34 }
 0x1fa   : > { %v2317_v38 = vpop.f32.mrf.mxu0 }
 0x1fb   : > { %2323 = vmatmul.mubr.msk.bf16.vlgmr.msra.gmra.mxu1 %vm445_vm1, %v3066_v5 }
 0x1fc   : > { %2335 = vmatpush3.bf16.msra.mxu1 %v2533_v36  ;;  %2338 = vmatprep.mubr.msk.bf16.mxu1 %vm2781_vm0, %v2780_v0  ;;  %v1262_v40 = vpop.f32.mrf.mxu0 }
 0x1fd   : > { %2336 = vmatprep.subr.bf16.mxu1 %v2780_v0  ;;  %v1263_v41 = vadd.f32 %v3010_v26, %v1262_v40 }
 0x1fe   : > { %v2332_v42 = vpop.f32.mrf.mxu0 }
 0x1ff   : > { %v2091_v43 = vmul.f32 -1.442695, %v1263_v41 }
 0x200   : > { %2337 = vmatpush3.bf16.msra.mxu1 %v2534_v39  ;;  %v1265_v46 = vpop.f32.mrf.mxu0 }
 0x201   : > { %2350 = vmatprep.subr.bf16.mxu1 %v2780_v0  ;;  %2567 = vpow2.f32 %v2091_v43 }
 0x202   : > { %v2333_v47 = vpop.f32.mrf.mxu0 }
 0x203   : > { %2339 = vmatmul.mubr.msk.bf16.vlgmr.msra.gmra.mxu1 %vm445_vm1, %v3066_v5  ;;  %v2545_v5 = vld [vmem:[#allocation7 + $0x28] sm:$0xff]  }
 0x204   : > { %2351 = vmatpush3.bf16.msra.mxu1 %v2535_v45  ;;  %v1402_v49 = vpop.f32.mrf.mxu0  ;;  %2366 = vmatprep.mubr.msk.bf16.mxu1 %vm2781_vm0, %v2780_v0 }
 0x205   : > { %2352 = vmatprep.subr.bf16.mxu1 %v2780_v0  ;;  %v1403_v61 = vadd.f32 %v3019_v35, %v1402_v49  ;;  %v2543_v35 = vld [vmem:[#allocation7 + $0x38] sm:$0xff]  }
 0x206   : > { %v2566_v26 = vpop.eup %2565  ;;  %v2348_v50 = vpop.f32.mrf.mxu0  ;;  %2371 = vmatpush3.bf16.msra.mxu0 %v2543_v35 }
 0x207   : > { %v1129_v51 = vadd.f32 1.0, %v2566_v26  ;;  %v1408_v63 = vmax.f32 %v1403_v61, 0.0  ;;  %2372 = vmatprep.subr.bf16.mxu0 %v2780_v0 }
 0x208   : > { %2353 = vmatpush3.bf16.msra.mxu1 %v2536_v48  ;;  %v1405_v53 = vpop.f32.mrf.mxu0 }
 0x209   : > { %2569 = vrcp.f32 %v1129_v51  ;;  %2354 = vmatprep.subr.bf16.mxu1 %v2780_v0  ;;  %v1409_v3 = vpack.c.bf16 %v1408_v63, %v1408_v63  ;;  %v2556_v63 = vld [vmem:[%s3306_s7 + $0x4] ss:$12 sps:$4 sm:$0xff]  }
 0x20a   : > { %v2349_v54 = vpop.f32.mrf.mxu0  ;;  %2373 = vmatpush3.bf16.msra.mxu0 %v2544_v4 }
 0x20b   : > { %2374 = vmatprep.subr.bf16.mxu0 %v2780_v0 }
 0x20c   : > { %2355 = vmatpush3.bf16.msra.mxu1 %v2537_v52 }
 0x20d   : > { %2356 = vmatprep.subr.bf16.mxu1 %v2780_v0 }
 0x20e   : > { %v2568_v56 = vpop.eup %2567  ;;  %2375 = vmatpush3.bf16.msra.mxu0 %v2545_v5 }
 0x20f   : > { %v1271_v57 = vadd.f32 1.0, %v2568_v56  ;;  %2376 = vmatprep.subr.bf16.mxu0 %v2780_v0 }
 0x210   : > { %2357 = vmatpush3.bf16.msra.mxu1 %v2538_v55 }
 0x211   : > { %2571 = vrcp.f32 %v1271_v57  ;;  %2358 = vmatprep.subr.bf16.mxu1 %v2780_v0 }
 0x212   : > { %2377 = vmatpush3.bf16.msra.mxu0 %v2546_v6 }
 0x213   : > { %2378 = vmatprep.subr.bf16.mxu0 %v2780_v0 }
 0x214   : > { %2359 = vmatpush3.bf16.msra.mxu1 %v2539_v58 }
 0x215   : > { %2360 = vmatprep.subr.bf16.mxu1 %v2780_v0 }
 0x216   : > { %v2570_v60 = vpop.eup %2569  ;;  %2379 = vmatpush3.bf16.msra.mxu0 %v2547_v7 }
 0x217   : > { %1132 = vst [vmem:[%s3110_s27 + $0x10] sm:$0xf] %v2570_v60  ;;  %2380 = vmatprep.subr.bf16.mxu0 %v2780_v0  ;;  %v2555_v60 = vld [vmem:[%s3306_s7 + $0x1c] ss:$12 sps:$4 sm:$0xff]  }
 0x218   : > { %2361 = vmatpush3.bf16.msra.mxu1 %v2540_v59 }
 0x219   : > { %2362 = vmatprep.subr.bf16.mxu1 %v2780_v0 }
 0x21a   : > { %2381 = vmatpush3.bf16.msra.mxu0 %v2549_v9 }
 0x21b   : > { %2382 = vmatprep.subr.bf16.mxu0 %v2780_v0 }
 0x21c   : > { %2363 = vmatpush3.bf16.msra.mxu1 %v2541_v62 }
 0x21d   : > { %2364 = vmatprep.subr.bf16.mxu1 %v2780_v0 }
 0x21e   : > { %v2572_v2 = vpop.eup %2571  ;;  %2383 = vmatpush3.bf16.msra.mxu0 %v2551_v12 }
 0x21f   : > { %1274 = vst [vmem:[%s3022_s22 + $0x28] sm:$0xff] %v2572_v2  ;;  %2384 = vmatprep.subr.bf16.mxu0 %v2780_v0 }
 0x220   : > { %2365 = vmatpush3.bf16.msra.mxu1 %v2542_v1 }
 0x221   : > { %2390 = vmatprep.subr.bf16.mxu1 %v2780_v0 }
 0x222   : > { %2385 = vmatpush3.bf16.msra.mxu0 %v2553_v16 }
 0x223   : > { %2367 = vmatmul.mubr.bf16.vlgmr.msra.gmra.mxu1 %v1409_v3  ;;  %2398 = vmatprep.subr.bf16.mxu0 %v2780_v0 }
 0x224   : > { %2394 = vmatprep.mubr.msk.bf16.mxu1 %vm2781_vm0, %v2780_v0  ;;  %2391 = vmatpush3.bf16.msra.mxu1 %v2548_v8 }
 0x225   : > { %2392 = vmatprep.subr.bf16.mxu1 %v2780_v0 }
 0x228   : > { %2393 = vmatpush3.bf16.msra.mxu1 %v2550_v11 }
 0x229   : > { %2406 = vmatprep.subr.bf16.mxu1 %v2780_v0 }
 0x22b   : > { %2395 = vmatmul.mubr.msk.bf16.vlgmr.msra.gmra.mxu1 %vm445_vm1, %v3176_v14 }
 0x22c   : > { %2407 = vmatpush3.bf16.msra.mxu1 %v2552_v15  ;;  %2410 = vmatprep.mubr.msk.bf16.mxu1 %vm2781_vm0, %v2780_v0 }
 0x22d   : > { %2408 = vmatprep.subr.bf16.mxu1 %v2780_v0 }
 0x230   : > { %2409 = vmatpush3.bf16.msra.mxu1 %v2554_v17 }
 0x233   : > { %2411 = vmatmul.mubr.msk.bf16.vlgmr.msra.gmra.mxu1 %vm445_vm1, %v3176_v14 }
 0x2ab   : > { %v913_v20 = vpop.f32.mrf.mxu1 }
 0x2ac   : > { %v914_v21 = vadd.f32 %v3197_v18, %v913_v20 }
 0x2ad   : > { %v2292_v22 = vpop.f32.mrf.mxu1 }
 0x2ae   : > { %v2066_v23 = vmul.f32 -1.442695, %v914_v21 }
 0x2af   : > { %v916_v24 = vpop.f32.mrf.mxu1 }
 0x2b0   : > { %2573 = vpow2.f32 %v2066_v23 }
 0x2b1   : > { %v2293_v25 = vpop.f32.mrf.mxu1 }
 0x2b3   : > { %v1050_v29 = vpop.f32.mrf.mxu1 }
 0x2b4   : > { %v1051_v30 = vadd.f32 %v3203_v27, %v1050_v29 }
 0x2b5   : > { %v2308_v32 = vpop.f32.mrf.mxu1 }
 0x2b6   : > { %v2075_v33 = vmul.f32 -1.442695, %v1051_v30 }
 0x2b7   : > { %v1053_v34 = vpop.f32.mrf.mxu1 }
 0x2b8   : > { %2575 = vpow2.f32 %v2075_v33 }
 0x2b9   : > { %v2309_v36 = vpop.f32.mrf.mxu1 }
 0x2bb   : > { %v1198_v37 = vpop.f32.mrf.mxu1 }
 0x2bc   : > { %v1199_v38 = vadd.f32 %v3016_v31, %v1198_v37 }
 0x2bd   : > { %v2574_v39 = vpop.eup %2573  ;;  %v2324_v40 = vpop.f32.mrf.mxu1 }
 0x2be   : > { %v922_v41 = vadd.f32 1.0, %v2574_v39  ;;  %1204 = vst [vmem:[%s3022_s22 + $0x20] sm:$0xff] %v1199_v38 }
 0x2bf   : > { %v1201_v42 = vpop.f32.mrf.mxu1 }
 0x2c0   : > { %2577 = vrcp.f32 %v922_v41 }
 0x2c1   : > { %v2325_v43 = vpop.f32.mrf.mxu1 }
 0x2c3   : > { %v1332_v45 = vpop.f32.mrf.mxu1 }
 0x2c4   : > { %v1333_v46 = vadd.f32 %v3026_v44, %v1332_v45 }
 0x2c5   : > { %v2576_v47 = vpop.eup %2575  ;;  %v2340_v48 = vpop.f32.mrf.mxu1 }
 0x2c6   : > { %v1059_v49 = vadd.f32 1.0, %v2576_v47  ;;  %v2096_v26 = vmul.f32 -1.442695, %v1333_v46 }
 0x2c7   : > { %v1335_v50 = vpop.f32.mrf.mxu1 }
 0x2c8   : > { %2579 = vrcp.f32 %v1059_v49 }
 0x2c9   : > { %2581 = vpow2.f32 %v2096_v26  ;;  %v2341_v31 = vpop.f32.mrf.mxu1 }
 0x2cd   : > { %v2578_v51 = vpop.eup %2577 }
 0x2ce   : > { %925 = vst [vmem:[%s3022_s22 + $0x18] sm:$0xff] %v2578_v51 }
 0x2d5   : > { %v2580_v52 = vpop.eup %2579 }
 0x2d6   : > { %v2582_v53 = vpop.eup %2581  ;;  %1062 = vst [vmem:[%s3110_s27 + $0x8] sm:$0xf] %v2580_v52 }
 0x2d7   : > { %v1341_v54 = vadd.f32 1.0, %v2582_v53 }
 0x2d9   : > { %2583 = vrcp.f32 %v1341_v54 }
 0x2e3   : > { %v1515_v55 = vpop.f32.mrf.mxu1 }
 0x2e4   : > { %v1516_v56 = vadd.f32 %v3091_v10, %v1515_v55 }
 0x2e5   : > { %v2368_v44 = vpop.f32.mrf.mxu1 }
 0x2e6   : > { %v2584_v57 = vpop.eup %2583  ;;  %v1521_v58 = vmax.f32 %v1516_v56, 0.0 }
 0x2e7   : > { %1344 = vst [vmem:[%s3022_s22 + $0x30] sm:$0xff] %v2584_v57  ;;  %v1518_v59 = vpop.f32.mrf.mxu1 }
 0x2e8   : > { %v1522_v61 = vpack.c.bf16 %v1521_v58, %v1521_v58 }
 0x2e9   : > { %v2369_v62 = vpop.f32.mrf.mxu1 }
 0x2ea   : > { %2387 = vmatmul.mubr.bf16.vlgmr.msra.gmra.mxu0 %v1522_v61 }
 0x2eb   : > { %2399 = vmatpush3.bf16.msra.mxu0 %v2555_v60  ;;  %2402 = vmatprep.mubr.msk.bf16.mxu0 %vm2781_vm0, %v2780_v0  ;;  %v1701_v10 = vpop.f32.mrf.mxu1 }
 0x2ec   : > { %2400 = vmatprep.subr.bf16.mxu0 %v2780_v0  ;;  %v1702_v1 = vadd.f32 %v3101_v19, %v1701_v10 }
 0x2ed   : > { %v2396_v2 = vpop.f32.mrf.mxu1 }
 0x2ee   : > { %v1708_v3 = vrot.slane %v1702_v1, 4 }
 0x2ef   : > { %2401 = vmatpush3.bf16.msra.mxu0 %v2556_v63  ;;  %v1704_v35 = vpop.f32.mrf.mxu1 }
 0x2f0   : > { %1710 = vst [vmem:[%s3110_s27] sm:$0xf0] %v1708_v3 }
 0x2f1   : > { %v2397_v4 = vpop.f32.mrf.mxu1 }
 0x2f2   : > { %2403 = vmatmul.mubr.msk.bf16.vlgmr.msra.gmra.mxu0 %vm445_vm1, %v3176_v14 }
 0x2f3   : > { %v1841_v5 = vpop.f32.mrf.mxu1 }
 0x2f4   : > { %v1842_v9 = vadd.f32 %v3120_v28, %v1841_v5 }
 0x2f5   : > { %v2412_v6 = vpop.f32.mrf.mxu1 }
 0x2f6   : > { %v2133_v0 = vmul.f32 -1.442695, %v1842_v9 }
 0x2f7   : > { %v1844_v7 = vpop.f32.mrf.mxu1 }
 0x2f8   : > { %2585 = vpow2.f32 %v2133_v0 }
 0x2f9   : > { %v2413_v8 = vpop.f32.mrf.mxu1 }
 0x305   : > { %v2586_v11 = vpop.eup %2585 }
 0x306   : > { %v1850_v12 = vadd.f32 1.0, %v2586_v11 }
 0x308   : > { %2587 = vrcp.f32 %v1850_v12 }
 0x315   : > { %v2588_v13 = vpop.eup %2587 }
 0x316   : > { %v1854_v14 = vrot.slane %v2588_v13, 4 }
 0x318   : > { %1856 = vst [vmem:[%s3110_s27 + $0x10] sm:$0xf0] %v1854_v14 }
 0x3aa   : > { %v1628_v19 = vpop.f32.mrf.mxu0 }
 0x3ab   : > { %v1629_v15 = vadd.f32 %v3197_v18, %v1628_v19 }
 0x3ac   : > { %v2388_v16 = vpop.f32.mrf.mxu0 }
 0x3ad   : > { %v2119_v17 = vmul.f32 -1.442695, %v1629_v15 }
 0x3ae   : > { %v1631_v20 = vpop.f32.mrf.mxu0 }
 0x3af   : > { %2589 = vpow2.f32 %v2119_v17 }
 0x3b0   : > { %v2389_v21 = vpop.f32.mrf.mxu0 }
 0x3b2   : > { %v1768_v22 = vpop.f32.mrf.mxu0 }
 0x3b3   : > { %v1769_v28 = vadd.f32 %v3203_v27, %v1768_v22 }
 0x3b4   : > { %v2404_v23 = vpop.f32.mrf.mxu0 }
 0x3b5   : > { %v2128_v24 = vmul.f32 -1.442695, %v1769_v28 }
 0x3b6   : > { %v1771_v25 = vpop.f32.mrf.mxu0 }
 0x3b7   : > { %2591 = vpow2.f32 %v2128_v24 }
 0x3b8   : > { %v2405_v29 = vpop.f32.mrf.mxu0 }
 0x3bc   : > { %v2590_v30 = vpop.eup %2589 }
 0x3bd   : > { %v1637_v18 = vadd.f32 1.0, %v2590_v30 }
 0x3bf   : > { %2593 = vrcp.f32 %v1637_v18 }
 0x3c4   : > { %v2592_v32 = vpop.eup %2591 }
 0x3c5   : > { %v1777_v33 = vadd.f32 1.0, %v2592_v32 }
 0x3c7   : > { %2595 = vrcp.f32 %v1777_v33 }
 0x3cc   : > { %v2594_v27 = vpop.eup %2593 }
 0x3cd   : > { %1640 = vst [vmem:[%s3022_s22 + $0x38] sm:$0xff] %v2594_v27 }
 0x3ce   : > { %2688 = shalt.err (!%p2685_p0)
}
 0x3cf   : > { %s2689_s22 = scalar_lea.hbm %s3237_s30, 1024  ;;  %s2693_s20 = scalar_lea.hbm %s3308_s9, 2048 }
 0x3d0   : > { %p2690_p6 = scmp.ne.s32.totalorder %s3237_s30, %s2689_s22  ;;  %p2694_p1 = scmp.lt.s32.totalorder %s3237_s30, %s3308_s9 }
 0x3d1   : > { %p2695_p5 = scmp.lt.s32.totalorder %s2693_s20, %s2689_s22 }
 0x3d2   : > { %p2691_p9 = pnand %p2690_p6, %p3329_p3 }
 0x3d3   : > { %p2696_p10 = por %p2695_p5, %p2694_p1 }
 0x3d4   : > { %p2692_p13 = pneg %p2691_p9 }
 0x3d6   : > { %p2697_p12 = pnand %p2696_p10, %p2692_p13 }
 0x3d8   : > { %2700 = shalt.err (!%p2697_p12)
}
 0x3d9   : > { %s2783_s0 = smov 512   ;;  %s2784_s11 = smov 32   ;;  %v2596_v34 = vpop.eup %2595 }
 0x3da   : > { %s3330_s12 = scalar_lea.sflag [#allocation4], %s3014_s26  ;;  %s2415_s21 = smul.u32 384, %s2862_s17  ;;  %v1781_v36 = vrot.slane %v2596_v34, 4 }
 0x3db   : > { %2428 = dma.vmem_to_hbm [thread:$0]  (%p3329_p3), %s3232_s29, 1024, %s3237_s30, %s3330_s12, %s2783_s0, %s2783_s0, %s2784_s11  }
 0x3dc   : > { %s1894_s25 = sshll.u32 %s3110_s27, 4  ;;  %s1892_s20 = scalar_lea.hbm %s3309_s10, %s2415_s21  ;;  %1783 = vst [vmem:[%s3110_s27 + $0x8] sm:$0xf0] %v1781_v36  ;;  %s1895_s25 = int_to_ptr.vmem [resolvable:$true] %s1894_s25 }
 0x3dd   : > { %s1863_s18 = scalar_lea.sflag [#allocation10], %s3014_s26  ;;  %s2701_s1 = scalar_lea.vmem %s1895_s25, 384 }
 0x3de   : > { %p2702_p2 = scmp.ne.s32.totalorder %s1895_s25, %s2701_s1  ;;  %s2785_s2 = smov [#allocation9]  }
 0x3df   : > { %s2705_s3 = sshll.u32 %s2785_s2, 4  ;;  %s2706_s3 = int_to_ptr.vmem [resolvable:$false] %s2705_s3 }
 0x3e0   : > { %p2703_p4 = pnand %p2702_p2, %p3329_p3  ;;  %s2707_s29 = scalar_lea.vmem %s2706_s3, 768 }
 0x3e1   : > { %p2708_p8 = scmp.lt.s32.totalorder %s1895_s25, %s2706_s3  ;;  %p2709_p11 = scmp.lt.s32.totalorder %s2707_s29, %s2701_s1 }
 0x3e2   : > { %p2704_p7 = pneg %p2703_p4 }
 0x3e3   : > { %p2710_p0 = por %p2709_p11, %p2708_p8 }
 0x3e5   : > { %p2711_p6 = pnand %p2710_p0, %p2704_p7 }
 0x3e7   : > { %2714 = shalt.err (!%p2711_p6)
}
 0x3e8   : > { %s2715_s17 = scalar_lea.hbm %s1892_s20, 384  ;;  %s2719_s30 = scalar_lea.hbm %s3309_s10, 768 }
 0x3e9   : > { %p2716_p9 = scmp.ne.s32.totalorder %s1892_s20, %s2715_s17  ;;  %p2720_p5 = scmp.lt.s32.totalorder %s1892_s20, %s3309_s10 }
 0x3ea   : > { %p2721_p10 = scmp.lt.s32.totalorder %s2719_s30, %s2715_s17 }
 0x3eb   : > { %p2717_p13 = pnand %p2716_p9, %p3329_p3 }
 0x3ec   : > { %p2722_p12 = por %p2721_p10, %p2720_p5 }
 0x3ed   : > { %p2718_p1 = pneg %p2717_p13 }
 0x3ef   : > { %p2723_p2 = pnand %p2722_p12, %p2718_p1 }
 0x3f1   : > { %2726 = shalt.err (!%p2723_p2)
}
 0x3f2   : > { %2429 = dma.vmem_to_hbm [thread:$0]  (%p3329_p3), %s1895_s25, 384, %s1892_s20, %s1863_s18  }
 0x3f3 PF: > { %p2455_p4 = scmp.ge.s32.totalorder %s2773_s16, 2  ;;  %s1906_s1 = sand.u32 1, %s2761_s13  }
 0x3f4   : > { %p3331_p7 = scmp.ne.s32.totalorder %s3318_s24, 0  ;;  %s1907_s2 = scalar_lea.sflag [#allocation4], %s1906_s1 }
 0x3f6   : > { %p2443_p8 = pnand %p2455_p4, %p3331_p7 }
 0x3f8   : > { %p2444_p11 = pneg %p2443_p8 }
 0x3fa   : > { %2752 = dma.done.wait (%p2444_p11), %s1907_s2, 1024  }
 0x3fb   : > { %2754 = vsyncadd (%p2444_p11), %s1907_s2, 4294966272  ;;  %s1916_s3 = scalar_lea.sflag [#allocation10], %s1906_s1 }
 0x3fc   : > { %2756 = dma.done.wait (%p2444_p11), %s1916_s3, 384  }
 0x3fd   : > { %2758 = vsyncadd (%p2444_p11), %s1916_s3, 4294966912  ;;  %s3332_s23 = sld [smem:[#allocation15_spill]]  ;;  %p26_p3 = scmp.ge.s32.totalorder %s2866_s19, 4  }
 0x3fe   : > { %s3333_s13 = smov %s2765_s14  ;;  %s3334_s14 = smov %s2769_s15 }
 0x3ff   : > { %s3336_s16 = smov %s2866_s19  ;;  %28 = sbr.rel (!%p26_p3) target bundleno = 12 (0xc), region = 122 }
 0x403   : > { %s3335_s15 = smov %s3332_s23 }
 0x404   :  { %1921 = vsyncpa [#allocation3], 1 }
 0x405   :  { %1923 = vsyncpa [#allocation3 + $0x1], 1 }
 0x406   :  { %1924 = vsyncpa [#allocation6], 1 }
 0x407   :  { %1925 = vsyncpa [#allocation4], 1 }
 0x408   :  { %1927 = vsyncpa [#allocation4 + $0x1], 1 }
 0x409   :  { %1928 = vsyncpa [#allocation10], 1 }
 0x40a   :  { %1930 = vsyncpa [#allocation10 + $0x1], 1 }

</bundles_post_ra>
